<compile_context>
chip_gen: v7x
topology: tpu7x:2x2x1
jax: 0.10.0
libtpu: 0.0.40
codegen_flags: <defaults>
</compile_context>

<pallas_src>
import functools

import jax
import jax.numpy as jnp
from jax import lax
from jax.experimental import pallas as pl
from jax.experimental.pallas import tpu as pltpu


# ---------------------------------------------------------------------------
# Kernel A: full-width Q/K/V projection, written as lane-dense head-group slabs.
# ---------------------------------------------------------------------------
def _proj_kernel(xq_ref, xk_ref, xv_ref, wq_ref, wk_ref, wv_ref,
                 q_ref, k_ref, v_ref, *, n_groups, gdq, gdk, gdv, scale,
                 mxu_dtype):
    xq = xq_ref[0].astype(mxu_dtype)                  # (tq, d_model)
    xk = xk_ref[0].astype(mxu_dtype)
    xv = xv_ref[0].astype(mxu_dtype)
    wq = wq_ref[...].astype(mxu_dtype)
    wk = wk_ref[...].astype(mxu_dtype)
    wv = wv_ref[...].astype(mxu_dtype)

    # Wide matmuls (N = H * d_head) fill the MXU; 1/sqrt(d_k) folded into Q here
    # so the score path never pays the scale multiply.
    q = jnp.dot(xq, wq, preferred_element_type=jnp.float32) * scale
    k = jnp.dot(xk, wk, preferred_element_type=jnp.float32)
    v = jnp.dot(xv, wv, preferred_element_type=jnp.float32)

    # Static scatter into G head-GROUP slabs (g*d_head wide -> lane-dense stores),
    # not H per-head tiles.
    for gi in range(n_groups):
        q_ref[0, gi] = q[:, gi * gdq:(gi + 1) * gdq].astype(q_ref.dtype)
        k_ref[0, gi] = k[:, gi * gdk:(gi + 1) * gdk].astype(k_ref.dtype)
        v_ref[0, gi] = v[:, gi * gdv:(gi + 1) * gdv].astype(v_ref.dtype)


# ---------------------------------------------------------------------------
# Kernel B: two-pass distance-scaled attention + fused fc projection + residual.
#   grid = (B, n_qt, G, 2, n_kt); out_ref is resident/accumulated across the
#   last three ("arbitrary") axes.
# ---------------------------------------------------------------------------
def _attn_fc_kernel(q_ref, k_ref, v_ref, wfc_ref, dist_ref, mask_ref, res_ref,
                    out_ref, attn_ref, m_ref, l_ref, ctx_ref,
                    *, g, d_q, d_k, d_v, mxu_dtype):
    hg = pl.program_id(2)          # head group
    ph = pl.program_id(3)          # softmax pass (0: stats, 1: emit)
    kt = pl.program_id(4)          # k tile
    n_kt = pl.num_programs(4)

    # Initialize the resident output block with the residual once per (b, q-tile).
    @pl.when((hg == 0) & (ph == 0) & (kt == 0))
    def _init_out():
        out_ref[0] = res_ref[0]

    dist = dist_ref[0]                                # (tq, tk)
    masked = mask_ref[0] != 0
    q_g = q_ref[0, 0]                                 # (tq, g*d_q), pre-scaled
    k_g = k_ref[0, 0]                                 # (tk, g*d_k)

    def scores(i):
        q_i = q_g[:, i * d_q:(i + 1) * d_q]
        k_i = k_g[:, i * d_k:(i + 1) * d_k]
        # q @ k^T without materializing k.T: contract the last dims.
        s = lax.dot_general(q_i, k_i, (((1,), (1,)), ((), ())),
                            preferred_element_type=jnp.float32)   # (tq, tk)
        s = dist * s
        return jnp.where(masked, jnp.float32(-1e10), s)

    # ---- pass 0: online row max + denominator over k tiles ----
    @pl.when(ph == 0)
    def _pass_stats():
        @pl.when(kt == 0)
        def _():
            m_ref[...] = jnp.full_like(m_ref, -jnp.inf)
            l_ref[...] = jnp.zeros_like(l_ref)
            ctx_ref[...] = jnp.zeros_like(ctx_ref)

        for i in range(g):
            s = scores(i)
            m_old = m_ref[i]
            m_new = jnp.maximum(m_old, jnp.max(s, axis=-1, keepdims=True))
            l_ref[i] = (l_ref[i] * jnp.exp(m_old - m_new)
                        + jnp.sum(jnp.exp(s - m_new), axis=-1, keepdims=True))
            m_ref[i] = m_new

    # ---- pass 1: exact normalized probs -> attn output; context accumulation ----
    @pl.when(ph == 1)
    def _pass_emit():
        v_g = v_ref[0, 0]                             # (tk, g*d_v)
        for i in range(g):
            s = scores(i)
            # Exact division (no approx reciprocal) so attn rows sum to 1 at f32
            # precision and match the PyTorch reference tightly.
            p = jnp.exp(s - m_ref[i]) / l_ref[i]
            attn_ref[0, i] = p.astype(attn_ref.dtype)
            v_i = v_g[:, i * d_v:(i + 1) * d_v]
            ctx_ref[i] = ctx_ref[i] + jnp.dot(
                p.astype(mxu_dtype), v_i.astype(mxu_dtype),
                preferred_element_type=jnp.float32)

        # Fused fc projection + accumulate into the resident output block.
        @pl.when(kt == n_kt - 1)
        def _fc_residual():
            wfc_g = wfc_ref[0]                        # (g*d_v, d_model)
            acc = out_ref[0]
            for i in range(g):
                acc = acc + jnp.dot(
                    ctx_ref[i].astype(mxu_dtype),
                    wfc_g[i * d_v:(i + 1) * d_v, :].astype(mxu_dtype),
                    preferred_element_type=jnp.float32)
            out_ref[0] = acc


# ---------------------------------------------------------------------------
# Wrapper
# ---------------------------------------------------------------------------
@functools.partial(jax.jit,
                   static_argnames=("n_heads", "q_tile", "k_tile", "use_bf16_mxu"))
def distance_attention(input_Q, input_K, input_V, dist_factor, attn_mask,
                       w_q, w_k, w_v, w_fc, *, n_heads,
                       q_tile=None, k_tile=None, use_bf16_mxu=False):
    """
    input_Q/K/V : (B, S, d_model) float32
    dist_factor : (B, S, S) float32
    attn_mask   : (B, S, S) integer/bool (nonzero => masked); int8 recommended
    w_q/w_k/w_v : (d_model, n_heads * d_head) float32   (x @ w layout)
    w_fc        : (n_heads * d_v, d_model) float32
    returns (output, attn) with shapes (B, S, d_model), (B, n_heads, S, S)
    """
    B, S, d_model = input_Q.shape
    H = n_heads
    d_q = w_q.shape[1] // H
    d_k = w_k.shape[1] // H
    d_v = w_v.shape[1] // H

    mxu_dtype = jnp.bfloat16 if use_bf16_mxu else jnp.float32
    proj_dtype = mxu_dtype
    p_item = jnp.dtype(proj_dtype).itemsize

    # ---- tile selection (sized for the 64 MiB v7x VMEM; both TCs busy) ----
    if q_tile is None:
        q_tile = min(S, 256)
        # Guarantee >= 2 programs on the "parallel" axes so both v7x TensorCores
        # get work when B == 1 / S is small.
        while (B * (S // q_tile) < 2 and q_tile > 8 and q_tile % 2 == 0
               and (q_tile // 2) % 8 == 0 and S % (q_tile // 2) == 0):
            q_tile //= 2
    assert S % q_tile == 0, "S must be divisible by q_tile"
    assert q_tile == S or q_tile % 8 == 0
    n_qt = S // q_tile

    if k_tile is None:
        if S <= 1024:
            k_tile = S
        else:
            k_tile = next((c for c in (512, 256, 128) if S % c == 0), S)
    assert S % k_tile == 0, "S must be divisible by k_tile"
    assert k_tile == S or k_tile % 128 == 0, "k_tile must be a lane multiple or S"
    n_kt = S // k_tile

    # ---- head grouping: pack g heads per grid step for lane-dense blocks ----
    d_max = max(d_q, d_k, d_v)
    g = 1
    for cand in range(H, 0, -1):
        if H % cand == 0 and cand * d_max <= max(128, d_max):
            g = cand
            break
    G = H // g

    scale = float(d_k) ** -0.5

    if attn_mask.dtype.itemsize > 1:
        attn_mask = attn_mask.astype(jnp.int8)

    # ---- Kernel A: projections at full head width, grouped-head output layout ----
    flops_a = 2 * B * S * d_model * H * (d_q + d_k + d_v)
    bytes_a = (4 * (3 * B * S * d_model + d_model * H * (d_q + d_k + d_v))
               + p_item * B * S * H * (d_q + d_k + d_v))
    blk_a = (4 * (3 * q_tile * d_model + d_model * H * (d_q + d_k + d_v))
             + p_item * q_tile * H * (d_q + d_k + d_v))
    vmem_a = min(max(32 << 20, 2 * blk_a + (2 << 20)), 100 << 20)

    q_proj, k_proj, v_proj = pl.pallas_call(
        functools.partial(_proj_kernel, n_groups=G, gdq=g * d_q, gdk=g * d_k,
                          gdv=g * d_v, scale=scale, mxu_dtype=mxu_dtype),
        out_shape=(
            jax.ShapeDtypeStruct((B, G, S, g * d_q), proj_dtype),
            jax.ShapeDtypeStruct((B, G, S, g * d_k), proj_dtype),
            jax.ShapeDtypeStruct((B, G, S, g * d_v), proj_dtype),
        ),
        grid_spec=pltpu.PrefetchScalarGridSpec(
            num_scalar_prefetch=0,
            grid=(B, n_qt),
            in_specs=[
                pl.BlockSpec((1, q_tile, d_model), lambda b, t: (b, t, 0)),   # input_Q
                pl.BlockSpec((1, q_tile, d_model), lambda b, t: (b, t, 0)),   # input_K
                pl.BlockSpec((1, q_tile, d_model), lambda b, t: (b, t, 0)),   # input_V
                pl.BlockSpec((d_model, H * d_q), lambda b, t: (0, 0)),        # W_Q
                pl.BlockSpec((d_model, H * d_k), lambda b, t: (0, 0)),        # W_K
                pl.BlockSpec((d_model, H * d_v), lambda b, t: (0, 0)),        # W_V
            ],
            out_specs=[
                pl.BlockSpec((1, G, q_tile, g * d_q), lambda b, t: (b, 0, t, 0)),
                pl.BlockSpec((1, G, q_tile, g * d_k), lambda b, t: (b, 0, t, 0)),
                pl.BlockSpec((1, G, q_tile, g * d_v), lambda b, t: (b, 0, t, 0)),
            ],
        ),
        compiler_params=pltpu.CompilerParams(
            dimension_semantics=("parallel", "parallel"),
            vmem_limit_bytes=int(vmem_a)),
        cost_estimate=pl.CostEstimate(flops=int(flops_a), transcendentals=0,
                                      bytes_accessed=int(bytes_a)),
    )(input_Q, input_K, input_V, w_q, w_k, w_v)

    # Per-group fc slabs: (H*d_v, d_model) -> (G, g*d_v, d_model)  (free reshape).
    w_fc_g = w_fc.reshape(G, g * d_v, d_model)

    # ---- Kernel B: two-pass attention + fused fc + residual ----
    blk_b = (q_tile * g * d_q * p_item           # q group
             + k_tile * g * d_k * p_item         # k tile
             + k_tile * g * d_v * p_item         # v tile
             + g * d_v * d_model * 4             # w_fc group
             + q_tile * k_tile * 4               # dist tile
             + q_tile * k_tile * 1               # mask tile (int8)
             + q_tile * d_model * 4              # residual
             + q_tile * d_model * 4              # output
             + g * q_tile * k_tile * 4)          # attn block
    scratch_b = (2 * g * q_tile + g * q_tile * d_v) * 4
    vmem_b = min(max(32 << 20, 2 * blk_b + scratch_b + (2 << 20)), 100 << 20)

    flops_b = (2 * B * H * S * S * (2 * d_k + d_v)       # scores (both passes) + ctx
               + 2 * B * S * H * d_v * d_model)          # fc
    transc_b = 2 * B * H * S * S                         # exp, both passes
    bytes_b = (4 * B * H * S * S                         # attn write (dominant)
               + 2 * (4 + 1) * B * S * S                 # dist + mask, two passes
               + p_item * B * n_qt * H * S * (2 * d_k + d_v)   # K (x2) / V refetch
               + 4 * 2 * B * S * d_model)                # residual + output

    output, attn = pl.pallas_call(
        functools.partial(_attn_fc_kernel, g=g, d_q=d_q, d_k=d_k, d_v=d_v,
                          mxu_dtype=mxu_dtype),
        out_shape=(
            jax.ShapeDtypeStruct((B, S, d_model), jnp.float32),
            jax.ShapeDtypeStruct((B, H, S, S), jnp.float32),
        ),
        grid_spec=pltpu.PrefetchScalarGridSpec(
            num_scalar_prefetch=0,
            grid=(B, n_qt, G, 2, n_kt),
            in_specs=[
                pl.BlockSpec((1, 1, q_tile, g * d_q),                        # Q group
                             lambda b, t, hg, ph, kt: (b, hg, t, 0)),
                pl.BlockSpec((1, 1, k_tile, g * d_k),                        # K group
                             lambda b, t, hg, ph, kt: (b, hg, kt, 0)),
                pl.BlockSpec((1, 1, k_tile, g * d_v),                        # V group
                             # frozen at tile 0 during pass 0 (V unused there)
                             lambda b, t, hg, ph, kt: (b, hg, kt * ph, 0)),
                pl.BlockSpec((1, g * d_v, d_model),                          # W_fc group
                             lambda b, t, hg, ph, kt: (hg, 0, 0)),
                pl.BlockSpec((1, q_tile, k_tile),                            # dist_factor
                             lambda b, t, hg, ph, kt: (b, t, kt)),
                pl.BlockSpec((1, q_tile, k_tile),                            # attn_mask
                             lambda b, t, hg, ph, kt: (b, t, kt)),
                pl.BlockSpec((1, q_tile, d_model),                           # residual
                             lambda b, t, hg, ph, kt: (b, t, 0)),
            ],
            out_specs=[
                pl.BlockSpec((1, q_tile, d_model),                           # output
                             lambda b, t, hg, ph, kt: (b, t, 0)),            # (resident acc)
                pl.BlockSpec((1, g, q_tile, k_tile),                         # attn probs
                             # index frozen during pass 0 -> no garbage writebacks
                             lambda b, t, hg, ph, kt: (b, hg, t, kt * ph)),
            ],
            scratch_shapes=[
                pltpu.VMEM((g, q_tile, 1), jnp.float32),    # running row max
                pltpu.VMEM((g, q_tile, 1), jnp.float32),    # running denominator
                pltpu.VMEM((g, q_tile, d_v), jnp.float32),  # context accumulator
            ],
        ),
        compiler_params=pltpu.CompilerParams(
            dimension_semantics=("parallel", "parallel", "arbitrary",
                                 "arbitrary", "arbitrary"),
            vmem_limit_bytes=int(vmem_b)),
        cost_estimate=pl.CostEstimate(flops=int(flops_b),
                                      transcendentals=int(transc_b),
                                      bytes_accessed=int(bytes_b)),
    )(q_proj, k_proj, v_proj, w_fc_g, dist_factor, attn_mask, input_Q)

    return output, attn


# ---------------------------------------------------------------------------
# Pure-JAX reference (mirrors the PyTorch forward)
# ---------------------------------------------------------------------------
def _reference(input_Q, input_K, input_V, dist_factor, attn_mask,
               w_q, w_k, w_v, w_fc, n_heads):
    B, S, d_model = input_Q.shape
    H = n_heads
    d_q = w_q.shape[1] // H
    d_k = w_k.shape[1] // H
    d_v = w_v.shape[1] // H
    Q = (input_Q @ w_q).reshape(B, S, H, d_q).transpose(0, 2, 1, 3)
    K = (input_K @ w_k).reshape(B, S, H, d_k).transpose(0, 2, 1, 3)
    V = (input_V @ w_v).reshape(B, S, H, d_v).transpose(0, 2, 1, 3)
    scores = jnp.einsum("bhqd,bhkd->bhqk", Q, K) / jnp.sqrt(jnp.float32(d_k))
    scores = dist_factor[:, None, :, :] * scores
    scores = jnp.where(attn_mask[:, None, :, :] != 0, -1e10, scores)
    attn = jax.nn.softmax(scores, axis=-1)
    ctx = jnp.einsum("bhqk,bhkd->bhqd", attn, V)
    ctx = ctx.transpose(0, 2, 1, 3).reshape(B, S, H * d_v)
    out = ctx @ w_fc + input_Q
    return out, attn


if __name__ == "__main__":
    B, S, d_model = 2, 8, 32
    n_heads, d_q, d_k, d_v = 2, 16, 16, 16

    key = jax.random.PRNGKey(0)
    keys = jax.random.split(key, 9)

    input_Q = jax.random.normal(keys[0], (B, S, d_model), jnp.float32)
    input_K = jax.random.normal(keys[1], (B, S, d_model), jnp.float32)
    input_V = jax.random.normal(keys[2], (B, S, d_model), jnp.float32)
    dist_factor = jax.random.uniform(keys[3], (B, S, S), jnp.float32,
                                     minval=0.5, maxval=1.5)
    # int8 mask: nonzero => masked (4x less DMA than int32).
    attn_mask = (jax.random.uniform(keys[4], (B, S, S)) < 0.2).astype(jnp.int8)

    # Deterministic parameter init (equivalent to nn.Linear weights, bias=False).
    w_q = jax.random.normal(keys[5], (d_model, n_heads * d_q), jnp.float32) * 0.1
    w_k = jax.random.normal(keys[6], (d_model, n_heads * d_k), jnp.float32) * 0.1
    w_v = jax.random.normal(keys[7], (d_model, n_heads * d_v), jnp.float32) * 0.1
    w_fc = jax.random.normal(keys[8], (n_heads * d_v, d_model), jnp.float32) * 0.1

    out, attn = distance_attention(input_Q, input_K, input_V, dist_factor,
                                   attn_mask, w_q, w_k, w_v, w_fc,
                                   n_heads=n_heads)
    jax.block_until_ready((out, attn))

    ref_out, ref_attn = _reference(input_Q, input_K, input_V, dist_factor,
                                   attn_mask, w_q, w_k, w_v, w_fc, n_heads)
    assert out.shape == (B, S, d_model)
    assert attn.shape == (B, n_heads, S, S)
    assert jnp.allclose(out, ref_out, atol=2e-3, rtol=2e-3), \
        float(jnp.max(jnp.abs(out - ref_out)))
    assert jnp.allclose(attn, ref_attn, atol=2e-3, rtol=2e-3), \
        float(jnp.max(jnp.abs(attn - ref_attn)))

    print("KERNEL_OK")
</pallas_src>

<mosaic_0001>
module attributes {stable_mosaic.version = 11 : i64} {
  func.func @_proj_kernel(%arg0: i32, %arg1: i32, %arg2: memref<1x8x32xf32, #tpu.memory_space<vmem>>, %arg3: memref<1x8x32xf32, #tpu.memory_space<vmem>>, %arg4: memref<1x8x32xf32, #tpu.memory_space<vmem>>, %arg5: memref<32x32xf32, #tpu.memory_space<vmem>>, %arg6: memref<32x32xf32, #tpu.memory_space<vmem>>, %arg7: memref<32x32xf32, #tpu.memory_space<vmem>>, %arg8: memref<1x1x8x32xf32, #tpu.memory_space<vmem>>, %arg9: memref<1x1x8x32xf32, #tpu.memory_space<vmem>>, %arg10: memref<1x1x8x32xf32, #tpu.memory_space<vmem>>) attributes {dimension_semantics = [#tpu.dimension_semantics<parallel>, #tpu.dimension_semantics<parallel>], iteration_bounds = array<i64: 2, 1>, scalar_prefetch = 0 : i64, scratch_operands = 0 : i64, tpu.core_type = #tpu.core_type<tc>, window_params = [{transform_indices = @transform_0, window_bounds = array<i64: 1, 8, 32>}, {transform_indices = @transform_1, window_bounds = array<i64: 1, 8, 32>}, {transform_indices = @transform_2, window_bounds = array<i64: 1, 8, 32>}, {pipeline_mode = #tpu.pipeline_mode<synchronous>, transform_indices = @transform_3, window_bounds = array<i64: 32, 32>}, {pipeline_mode = #tpu.pipeline_mode<synchronous>, transform_indices = @transform_4, window_bounds = array<i64: 32, 32>}, {pipeline_mode = #tpu.pipeline_mode<synchronous>, transform_indices = @transform_5, window_bounds = array<i64: 32, 32>}, {transform_indices = @transform_6, window_bounds = array<i64: 1, 1, 8, 32>}, {transform_indices = @transform_7, window_bounds = array<i64: 1, 1, 8, 32>}, {transform_indices = @transform_8, window_bounds = array<i64: 1, 1, 8, 32>}]} {
    %c0 = arith.constant 0 : index
    %c0_0 = arith.constant 0 : index
    %c0_1 = arith.constant 0 : index
    %0 = vector.load %arg2[%c0, %c0_0, %c0_1] : memref<1x8x32xf32, #tpu.memory_space<vmem>>, vector<1x8x32xf32>
    %1 = vector.shape_cast %0 : vector<1x8x32xf32> to vector<8x32xf32>
    %c0_2 = arith.constant 0 : index
    %c0_3 = arith.constant 0 : index
    %c0_4 = arith.constant 0 : index
    %2 = vector.load %arg3[%c0_2, %c0_3, %c0_4] : memref<1x8x32xf32, #tpu.memory_space<vmem>>, vector<1x8x32xf32>
    %3 = vector.shape_cast %2 : vector<1x8x32xf32> to vector<8x32xf32>
    %c0_5 = arith.constant 0 : index
    %c0_6 = arith.constant 0 : index
    %c0_7 = arith.constant 0 : index
    %4 = vector.load %arg4[%c0_5, %c0_6, %c0_7] : memref<1x8x32xf32, #tpu.memory_space<vmem>>, vector<1x8x32xf32>
    %5 = vector.shape_cast %4 : vector<1x8x32xf32> to vector<8x32xf32>
    %c0_8 = arith.constant 0 : index
    %c0_9 = arith.constant 0 : index
    %6 = vector.load %arg5[%c0_8, %c0_9] : memref<32x32xf32, #tpu.memory_space<vmem>>, vector<32x32xf32>
    %c0_10 = arith.constant 0 : index
    %c0_11 = arith.constant 0 : index
    %7 = vector.load %arg6[%c0_10, %c0_11] : memref<32x32xf32, #tpu.memory_space<vmem>>, vector<32x32xf32>
    %c0_12 = arith.constant 0 : index
    %c0_13 = arith.constant 0 : index
    %8 = vector.load %arg7[%c0_12, %c0_13] : memref<32x32xf32, #tpu.memory_space<vmem>>, vector<32x32xf32>
    %cst = arith.constant dense<0.000000e+00> : vector<8x32xf32>
    %9 = tpu.matmul %1, %6, %cst {dimension_numbers = #tpu.dot_dimension_numbers<[1], [0], [0], [1], [0, 0, 1, 1], [], []>} : vector<8x32xf32>, vector<32x32xf32>, vector<8x32xf32> -> vector<8x32xf32>
    %cst_14 = arith.constant 2.500000e-01 : f32
    %10 = vector.broadcast %cst_14 : f32 to vector<8x32xf32>
    %11 = arith.mulf %9, %10 : vector<8x32xf32>
    %cst_15 = arith.constant dense<0.000000e+00> : vector<8x32xf32>
    %12 = tpu.matmul %3, %7, %cst_15 {dimension_numbers = #tpu.dot_dimension_numbers<[1], [0], [0], [1], [0, 0, 1, 1], [], []>} : vector<8x32xf32>, vector<32x32xf32>, vector<8x32xf32> -> vector<8x32xf32>
    %cst_16 = arith.constant dense<0.000000e+00> : vector<8x32xf32>
    %13 = tpu.matmul %5, %8, %cst_16 {dimension_numbers = #tpu.dot_dimension_numbers<[1], [0], [0], [1], [0, 0, 1, 1], [], []>} : vector<8x32xf32>, vector<32x32xf32>, vector<8x32xf32> -> vector<8x32xf32>
    %c0_17 = arith.constant 0 : index
    %c0_18 = arith.constant 0 : index
    %c0_19 = arith.constant 0 : index
    %c0_20 = arith.constant 0 : index
    %14 = vector.load %arg8[%c0_17, %c0_18, %c0_19, %c0_20] : memref<1x1x8x32xf32, #tpu.memory_space<vmem>>, vector<1x1x8x32xf32>
    %15 = vector.shape_cast %14 : vector<1x1x8x32xf32> to vector<8x32xf32>
    %16 = vector.shape_cast %11 : vector<8x32xf32> to vector<1x1x8x32xf32>
    tpu.vector_store %arg8[%c0_17, %c0_18, %c0_19, %c0_20], %16 {strides = array<i32>} : memref<1x1x8x32xf32, #tpu.memory_space<vmem>>, vector<1x1x8x32xf32>,
    %c0_21 = arith.constant 0 : index
    %c0_22 = arith.constant 0 : index
    %c0_23 = arith.constant 0 : index
    %c0_24 = arith.constant 0 : index
    %17 = vector.load %arg9[%c0_21, %c0_22, %c0_23, %c0_24] : memref<1x1x8x32xf32, #tpu.memory_space<vmem>>, vector<1x1x8x32xf32>
    %18 = vector.shape_cast %17 : vector<1x1x8x32xf32> to vector<8x32xf32>
    %19 = vector.shape_cast %12 : vector<8x32xf32> to vector<1x1x8x32xf32>
    tpu.vector_store %arg9[%c0_21, %c0_22, %c0_23, %c0_24], %19 {strides = array<i32>} : memref<1x1x8x32xf32, #tpu.memory_space<vmem>>, vector<1x1x8x32xf32>,
    %c0_25 = arith.constant 0 : index
    %c0_26 = arith.constant 0 : index
    %c0_27 = arith.constant 0 : index
    %c0_28 = arith.constant 0 : index
    %20 = vector.load %arg10[%c0_25, %c0_26, %c0_27, %c0_28] : memref<1x1x8x32xf32, #tpu.memory_space<vmem>>, vector<1x1x8x32xf32>
    %21 = vector.shape_cast %20 : vector<1x1x8x32xf32> to vector<8x32xf32>
    %22 = vector.shape_cast %13 : vector<8x32xf32> to vector<1x1x8x32xf32>
    tpu.vector_store %arg10[%c0_25, %c0_26, %c0_27, %c0_28], %22 {strides = array<i32>} : memref<1x1x8x32xf32, #tpu.memory_space<vmem>>, vector<1x1x8x32xf32>,
    return
  }
  func.func @transform_0(%arg0: i32, %arg1: i32) -> (i32, i32, i32) {
    %c0_i32 = arith.constant 0 : i32
    %c0_i32_0 = arith.constant 0 : i32
    return %arg0, %arg1, %c0_i32 : i32, i32, i32
  }
  func.func @transform_1(%arg0: i32, %arg1: i32) -> (i32, i32, i32) {
    %c0_i32 = arith.constant 0 : i32
    %c0_i32_0 = arith.constant 0 : i32
    return %arg0, %arg1, %c0_i32 : i32, i32, i32
  }
  func.func @transform_2(%arg0: i32, %arg1: i32) -> (i32, i32, i32) {
    %c0_i32 = arith.constant 0 : i32
    %c0_i32_0 = arith.constant 0 : i32
    return %arg0, %arg1, %c0_i32 : i32, i32, i32
  }
  func.func @transform_3(%arg0: i32, %arg1: i32) -> (i32, i32) {
    %c0_i32 = arith.constant 0 : i32
    %c0_i32_0 = arith.constant 0 : i32
    %c0_i32_1 = arith.constant 0 : i32
    return %c0_i32, %c0_i32_0 : i32, i32
  }
  func.func @transform_4(%arg0: i32, %arg1: i32) -> (i32, i32) {
    %c0_i32 = arith.constant 0 : i32
    %c0_i32_0 = arith.constant 0 : i32
    %c0_i32_1 = arith.constant 0 : i32
    return %c0_i32, %c0_i32_0 : i32, i32
  }
  func.func @transform_5(%arg0: i32, %arg1: i32) -> (i32, i32) {
    %c0_i32 = arith.constant 0 : i32
    %c0_i32_0 = arith.constant 0 : i32
    %c0_i32_1 = arith.constant 0 : i32
    return %c0_i32, %c0_i32_0 : i32, i32
  }
  func.func @transform_6(%arg0: i32, %arg1: i32) -> (i32, i32, i32, i32) {
    %c0_i32 = arith.constant 0 : i32
    %c0_i32_0 = arith.constant 0 : i32
    %c0_i32_1 = arith.constant 0 : i32
    return %arg0, %c0_i32, %arg1, %c0_i32_0 : i32, i32, i32, i32
  }
  func.func @transform_7(%arg0: i32, %arg1: i32) -> (i32, i32, i32, i32) {
    %c0_i32 = arith.constant 0 : i32
    %c0_i32_0 = arith.constant 0 : i32
    %c0_i32_1 = arith.constant 0 : i32
    return %arg0, %c0_i32, %arg1, %c0_i32_0 : i32, i32, i32, i32
  }
  func.func @transform_8(%arg0: i32, %arg1: i32) -> (i32, i32, i32, i32) {
    %c0_i32 = arith.constant 0 : i32
    %c0_i32_0 = arith.constant 0 : i32
    %c0_i32_1 = arith.constant 0 : i32
    return %arg0, %c0_i32, %arg1, %c0_i32_0 : i32, i32, i32, i32
  }
}

module attributes {stable_mosaic.version = 11 : i64} {
  func.func @_attn_fc_kernel(%arg0: i32, %arg1: i32, %arg2: i32, %arg3: i32, %arg4: i32, %arg5: memref<1x1x8x32xf32, #tpu.memory_space<vmem>>, %arg6: memref<1x1x8x32xf32, #tpu.memory_space<vmem>>, %arg7: memref<1x1x8x32xf32, #tpu.memory_space<vmem>>, %arg8: memref<1x32x32xf32, #tpu.memory_space<vmem>>, %arg9: memref<1x8x8xf32, #tpu.memory_space<vmem>>, %arg10: memref<1x8x8xi8, #tpu.memory_space<vmem>>, %arg11: memref<1x8x32xf32, #tpu.memory_space<vmem>>, %arg12: memref<1x8x32xf32, #tpu.memory_space<vmem>>, %arg13: memref<1x2x8x8xf32, #tpu.memory_space<vmem>>, %arg14: memref<2x8x1xf32, #tpu.memory_space<vmem>>, %arg15: memref<2x8x1xf32, #tpu.memory_space<vmem>>, %arg16: memref<2x8x16xf32, #tpu.memory_space<vmem>>) attributes {dimension_semantics = [#tpu.dimension_semantics<parallel>, #tpu.dimension_semantics<parallel>, #tpu.dimension_semantics<arbitrary>, #tpu.dimension_semantics<arbitrary>, #tpu.dimension_semantics<arbitrary>], iteration_bounds = array<i64: 2, 1, 1, 2, 1>, scalar_prefetch = 0 : i64, scratch_operands = 3 : i64, tpu.core_type = #tpu.core_type<tc>, window_params = [{transform_indices = @transform_0, window_bounds = array<i64: 1, 1, 8, 32>}, {transform_indices = @transform_1, window_bounds = array<i64: 1, 1, 8, 32>}, {transform_indices = @transform_2, window_bounds = array<i64: 1, 1, 8, 32>}, {transform_indices = @transform_3, window_bounds = array<i64: 1, 32, 32>}, {transform_indices = @transform_4, window_bounds = array<i64: 1, 8, 8>}, {transform_indices = @transform_5, window_bounds = array<i64: 1, 8, 8>}, {transform_indices = @transform_6, window_bounds = array<i64: 1, 8, 32>}, {transform_indices = @transform_7, window_bounds = array<i64: 1, 8, 32>}, {transform_indices = @transform_8, window_bounds = array<i64: 1, 2, 8, 8>}]} {
    %c0_i32 = arith.constant 0 : i32
    %0 = arith.cmpi eq, %arg2, %c0_i32 : i32
    %c0_i32_0 = arith.constant 0 : i32
    %1 = arith.cmpi eq, %arg3, %c0_i32_0 : i32
    %2 = arith.andi %0, %1 : i1
    %c0_i32_1 = arith.constant 0 : i32
    %3 = arith.cmpi eq, %arg4, %c0_i32_1 : i32
    %4 = arith.andi %2, %3 : i1
    %5 = arith.extui %4 : i1 to i32
    %c0_i32_2 = arith.constant 0 : i32
    %6 = arith.cmpi ne, %5, %c0_i32_2 : i32
    scf.if %6 {
      %c0_19 = arith.constant 0 : index
      %c0_20 = arith.constant 0 : index
      %c0_21 = arith.constant 0 : index
      %23 = vector.load %arg11[%c0_19, %c0_20, %c0_21] : memref<1x8x32xf32, #tpu.memory_space<vmem>>, vector<1x8x32xf32>
      %24 = vector.shape_cast %23 : vector<1x8x32xf32> to vector<8x32xf32>
      %c0_22 = arith.constant 0 : index
      %c0_23 = arith.constant 0 : index
      %c0_24 = arith.constant 0 : index
      %25 = vector.load %arg12[%c0_22, %c0_23, %c0_24] : memref<1x8x32xf32, #tpu.memory_space<vmem>>, vector<1x8x32xf32>
      %26 = vector.shape_cast %25 : vector<1x8x32xf32> to vector<8x32xf32>
      %27 = vector.shape_cast %24 : vector<8x32xf32> to vector<1x8x32xf32>
      tpu.vector_store %arg12[%c0_22, %c0_23, %c0_24], %27 {strides = array<i32>} : memref<1x8x32xf32, #tpu.memory_space<vmem>>, vector<1x8x32xf32>,
    } else {
    }
    %c0 = arith.constant 0 : index
    %c0_3 = arith.constant 0 : index
    %c0_4 = arith.constant 0 : index
    %7 = vector.load %arg9[%c0, %c0_3, %c0_4] : memref<1x8x8xf32, #tpu.memory_space<vmem>>, vector<1x8x8xf32>
    %8 = vector.shape_cast %7 : vector<1x8x8xf32> to vector<8x8xf32>
    %c0_5 = arith.constant 0 : index
    %c0_6 = arith.constant 0 : index
    %c0_7 = arith.constant 0 : index
    %9 = vector.load %arg10[%c0_5, %c0_6, %c0_7] : memref<1x8x8xi8, #tpu.memory_space<vmem>>, vector<1x8x8xi8>
    %10 = vector.shape_cast %9 : vector<1x8x8xi8> to vector<8x8xi8>
    %c0_i8 = arith.constant 0 : i8
    %11 = vector.broadcast %c0_i8 : i8 to vector<8x8xi8>
    %12 = arith.cmpi ne, %10, %11 : vector<8x8xi8>
    %c0_8 = arith.constant 0 : index
    %c0_9 = arith.constant 0 : index
    %c0_10 = arith.constant 0 : index
    %c0_11 = arith.constant 0 : index
    %13 = vector.load %arg5[%c0_8, %c0_9, %c0_10, %c0_11] : memref<1x1x8x32xf32, #tpu.memory_space<vmem>>, vector<1x1x8x32xf32>
    %14 = vector.shape_cast %13 : vector<1x1x8x32xf32> to vector<8x32xf32>
    %c0_12 = arith.constant 0 : index
    %c0_13 = arith.constant 0 : index
    %c0_14 = arith.constant 0 : index
    %c0_15 = arith.constant 0 : index
    %15 = vector.load %arg6[%c0_12, %c0_13, %c0_14, %c0_15] : memref<1x1x8x32xf32, #tpu.memory_space<vmem>>, vector<1x1x8x32xf32>
    %16 = vector.shape_cast %15 : vector<1x1x8x32xf32> to vector<8x32xf32>
    %c0_i32_16 = arith.constant 0 : i32
    %17 = arith.cmpi eq, %arg3, %c0_i32_16 : i32
    %18 = arith.extui %17 : i1 to i32
    %c0_i32_17 = arith.constant 0 : i32
    %19 = arith.cmpi ne, %18, %c0_i32_17 : i32
    scf.if %19 {
      %c0_i32_19 = arith.constant 0 : i32
      %23 = arith.cmpi eq, %arg4, %c0_i32_19 : i32
      %24 = arith.extui %23 : i1 to i32
      %c0_i32_20 = arith.constant 0 : i32
      %25 = arith.cmpi ne, %24, %c0_i32_20 : i32
      scf.if %25 {
        %cst_51 = arith.constant 0xFF800000 : f32
        %82 = vector.broadcast %cst_51 : f32 to vector<2x8x1xf32>
        %c0_52 = arith.constant 0 : index
        %c0_53 = arith.constant 0 : index
        %c0_54 = arith.constant 0 : index
        %83 = vector.load %arg14[%c0_52, %c0_53, %c0_54] : memref<2x8x1xf32, #tpu.memory_space<vmem>>, vector<2x8x1xf32>
        tpu.vector_store %arg14[%c0_52, %c0_53, %c0_54], %82 {strides = array<i32>} : memref<2x8x1xf32, #tpu.memory_space<vmem>>, vector<2x8x1xf32>,
        %cst_55 = arith.constant 0.000000e+00 : f32
        %84 = vector.broadcast %cst_55 : f32 to vector<2x8x1xf32>
        %c0_56 = arith.constant 0 : index
        %c0_57 = arith.constant 0 : index
        %c0_58 = arith.constant 0 : index
        %85 = vector.load %arg15[%c0_56, %c0_57, %c0_58] : memref<2x8x1xf32, #tpu.memory_space<vmem>>, vector<2x8x1xf32>
        tpu.vector_store %arg15[%c0_56, %c0_57, %c0_58], %84 {strides = array<i32>} : memref<2x8x1xf32, #tpu.memory_space<vmem>>, vector<2x8x1xf32>,
        %cst_59 = arith.constant 0.000000e+00 : f32
        %86 = vector.broadcast %cst_59 : f32 to vector<2x8x16xf32>
        %c0_60 = arith.constant 0 : index
        %c0_61 = arith.constant 0 : index
        %c0_62 = arith.constant 0 : index
        %87 = vector.load %arg16[%c0_60, %c0_61, %c0_62] : memref<2x8x16xf32, #tpu.memory_space<vmem>>, vector<2x8x16xf32>
        tpu.vector_store %arg16[%c0_60, %c0_61, %c0_62], %86 {strides = array<i32>} : memref<2x8x16xf32, #tpu.memory_space<vmem>>, vector<2x8x16xf32>,
      } else {
      }
      %26 = vector.extract_strided_slice %14 {offsets = [0, 0], sizes = [8, 16], strides = [1, 1]} : vector<8x32xf32> to vector<8x16xf32>
      %27 = vector.extract_strided_slice %16 {offsets = [0, 0], sizes = [8, 16], strides = [1, 1]} : vector<8x32xf32> to vector<8x16xf32>
      %cst = arith.constant dense<0.000000e+00> : vector<8x8xf32>
      %28 = tpu.matmul %26, %27, %cst {dimension_numbers = #tpu.dot_dimension_numbers<[1], [1], [0], [0], [0, 0, 1, 0], [], []>} : vector<8x16xf32>, vector<8x16xf32>, vector<8x8xf32> -> vector<8x8xf32>
      %29 = arith.mulf %8, %28 : vector<8x8xf32>
      %cst_21 = arith.constant -1.000000e+10 : f32
      %30 = vector.broadcast %cst_21 : f32 to vector<8x8xf32>
      %31 = arith.select %12, %30, %29 : vector<8x8xi1>, vector<8x8xf32>
      %c0_22 = arith.constant 0 : index
      %c0_23 = arith.constant 0 : index
      %c0_24 = arith.constant 0 : index
      %32 = vector.load %arg14[%c0_22, %c0_23, %c0_24] : memref<2x8x1xf32, #tpu.memory_space<vmem>>, vector<1x8x1xf32>
      %33 = vector.shape_cast %32 : vector<1x8x1xf32> to vector<8x1xf32>
      %cst_25 = arith.constant dense<0xFF800000> : vector<8xf32>
      %34 = vector.multi_reduction <maximumf>, %31, %cst_25 [1] : vector<8x8xf32> to vector<8xf32>
      %35 = vector.shape_cast %34 : vector<8xf32> to vector<8x1xf32>
      %36 = arith.maximumf %33, %35 : vector<8x1xf32>
      %c0_26 = arith.constant 0 : index
      %c0_27 = arith.constant 0 : index
      %c0_28 = arith.constant 0 : index
      %37 = vector.load %arg15[%c0_26, %c0_27, %c0_28] : memref<2x8x1xf32, #tpu.memory_space<vmem>>, vector<1x8x1xf32>
      %38 = vector.shape_cast %37 : vector<1x8x1xf32> to vector<8x1xf32>
      %39 = arith.subf %33, %36 : vector<8x1xf32>
      %40 = math.exp %39 : vector<8x1xf32>
      %41 = arith.mulf %38, %40 : vector<8x1xf32>
      %42 = vector.broadcast %36 : vector<8x1xf32> to vector<8x8xf32>
      %43 = arith.subf %31, %42 : vector<8x8xf32>
      %44 = math.exp %43 : vector<8x8xf32>
      %cst_29 = arith.constant dense<0.000000e+00> : vector<8xf32>
      %45 = vector.multi_reduction <add>, %44, %cst_29 [1] : vector<8x8xf32> to vector<8xf32>
      %46 = vector.shape_cast %45 : vector<8xf32> to vector<8x1xf32>
      %47 = arith.addf %41, %46 : vector<8x1xf32>
      %c0_30 = arith.constant 0 : index
      %c0_31 = arith.constant 0 : index
      %c0_32 = arith.constant 0 : index
      %48 = vector.load %arg15[%c0_30, %c0_31, %c0_32] : memref<2x8x1xf32, #tpu.memory_space<vmem>>, vector<1x8x1xf32>
      %49 = vector.shape_cast %48 : vector<1x8x1xf32> to vector<8x1xf32>
      %50 = vector.shape_cast %47 : vector<8x1xf32> to vector<1x8x1xf32>
      tpu.vector_store %arg15[%c0_30, %c0_31, %c0_32], %50 {strides = array<i32>} : memref<2x8x1xf32, #tpu.memory_space<vmem>>, vector<1x8x1xf32>,
      %c0_33 = arith.constant 0 : index
      %c0_34 = arith.constant 0 : index
      %c0_35 = arith.constant 0 : index
      %51 = vector.load %arg14[%c0_33, %c0_34, %c0_35] : memref<2x8x1xf32, #tpu.memory_space<vmem>>, vector<1x8x1xf32>
      %52 = vector.shape_cast %51 : vector<1x8x1xf32> to vector<8x1xf32>
      %53 = vector.shape_cast %36 : vector<8x1xf32> to vector<1x8x1xf32>
      tpu.vector_store %arg14[%c0_33, %c0_34, %c0_35], %53 {strides = array<i32>} : memref<2x8x1xf32, #tpu.memory_space<vmem>>, vector<1x8x1xf32>,
      %54 = vector.extract_strided_slice %14 {offsets = [0, 16], sizes = [8, 16], strides = [1, 1]} : vector<8x32xf32> to vector<8x16xf32>
      %55 = vector.extract_strided_slice %16 {offsets = [0, 16], sizes = [8, 16], strides = [1, 1]} : vector<8x32xf32> to vector<8x16xf32>
      %cst_36 = arith.constant dense<0.000000e+00> : vector<8x8xf32>
      %56 = tpu.matmul %54, %55, %cst_36 {dimension_numbers = #tpu.dot_dimension_numbers<[1], [1], [0], [0], [0, 0, 1, 0], [], []>} : vector<8x16xf32>, vector<8x16xf32>, vector<8x8xf32> -> vector<8x8xf32>
      %57 = arith.mulf %8, %56 : vector<8x8xf32>
      %cst_37 = arith.constant -1.000000e+10 : f32
      %58 = vector.broadcast %cst_37 : f32 to vector<8x8xf32>
      %59 = arith.select %12, %58, %57 : vector<8x8xi1>, vector<8x8xf32>
      %c1 = arith.constant 1 : index
      %c0_38 = arith.constant 0 : index
      %c0_39 = arith.constant 0 : index
      %60 = vector.load %arg14[%c1, %c0_38, %c0_39] : memref<2x8x1xf32, #tpu.memory_space<vmem>>, vector<1x8x1xf32>
      %61 = vector.shape_cast %60 : vector<1x8x1xf32> to vector<8x1xf32>
      %cst_40 = arith.constant dense<0xFF800000> : vector<8xf32>
      %62 = vector.multi_reduction <maximumf>, %59, %cst_40 [1] : vector<8x8xf32> to vector<8xf32>
      %63 = vector.shape_cast %62 : vector<8xf32> to vector<8x1xf32>
      %64 = arith.maximumf %61, %63 : vector<8x1xf32>
      %c1_41 = arith.constant 1 : index
      %c0_42 = arith.constant 0 : index
      %c0_43 = arith.constant 0 : index
      %65 = vector.load %arg15[%c1_41, %c0_42, %c0_43] : memref<2x8x1xf32, #tpu.memory_space<vmem>>, vector<1x8x1xf32>
      %66 = vector.shape_cast %65 : vector<1x8x1xf32> to vector<8x1xf32>
      %67 = arith.subf %61, %64 : vector<8x1xf32>
      %68 = math.exp %67 : vector<8x1xf32>
      %69 = arith.mulf %66, %68 : vector<8x1xf32>
      %70 = vector.broadcast %64 : vector<8x1xf32> to vector<8x8xf32>
      %71 = arith.subf %59, %70 : vector<8x8xf32>
      %72 = math.exp %71 : vector<8x8xf32>
      %cst_44 = arith.constant dense<0.000000e+00> : vector<8xf32>
      %73 = vector.multi_reduction <add>, %72, %cst_44 [1] : vector<8x8xf32> to vector<8xf32>
      %74 = vector.shape_cast %73 : vector<8xf32> to vector<8x1xf32>
      %75 = arith.addf %69, %74 : vector<8x1xf32>
      %c1_45 = arith.constant 1 : index
      %c0_46 = arith.constant 0 : index
      %c0_47 = arith.constant 0 : index
      %76 = vector.load %arg15[%c1_45, %c0_46, %c0_47] : memref<2x8x1xf32, #tpu.memory_space<vmem>>, vector<1x8x1xf32>
      %77 = vector.shape_cast %76 : vector<1x8x1xf32> to vector<8x1xf32>
      %78 = vector.shape_cast %75 : vector<8x1xf32> to vector<1x8x1xf32>
      tpu.vector_store %arg15[%c1_45, %c0_46, %c0_47], %78 {strides = array<i32>} : memref<2x8x1xf32, #tpu.memory_space<vmem>>, vector<1x8x1xf32>,
      %c1_48 = arith.constant 1 : index
      %c0_49 = arith.constant 0 : index
      %c0_50 = arith.constant 0 : index
      %79 = vector.load %arg14[%c1_48, %c0_49, %c0_50] : memref<2x8x1xf32, #tpu.memory_space<vmem>>, vector<1x8x1xf32>
      %80 = vector.shape_cast %79 : vector<1x8x1xf32> to vector<8x1xf32>
      %81 = vector.shape_cast %64 : vector<8x1xf32> to vector<1x8x1xf32>
      tpu.vector_store %arg14[%c1_48, %c0_49, %c0_50], %81 {strides = array<i32>} : memref<2x8x1xf32, #tpu.memory_space<vmem>>, vector<1x8x1xf32>,
    } else {
    }
    %c1_i32 = arith.constant 1 : i32
    %20 = arith.cmpi eq, %arg3, %c1_i32 : i32
    %21 = arith.extui %20 : i1 to i32
    %c0_i32_18 = arith.constant 0 : i32
    %22 = arith.cmpi ne, %21, %c0_i32_18 : i32
    scf.if %22 {
      %c0_19 = arith.constant 0 : index
      %c0_20 = arith.constant 0 : index
      %c0_21 = arith.constant 0 : index
      %c0_22 = arith.constant 0 : index
      %23 = vector.load %arg7[%c0_19, %c0_20, %c0_21, %c0_22] : memref<1x1x8x32xf32, #tpu.memory_space<vmem>>, vector<1x1x8x32xf32>
      %24 = vector.shape_cast %23 : vector<1x1x8x32xf32> to vector<8x32xf32>
      %25 = vector.extract_strided_slice %14 {offsets = [0, 0], sizes = [8, 16], strides = [1, 1]} : vector<8x32xf32> to vector<8x16xf32>
      %26 = vector.extract_strided_slice %16 {offsets = [0, 0], sizes = [8, 16], strides = [1, 1]} : vector<8x32xf32> to vector<8x16xf32>
      %cst = arith.constant dense<0.000000e+00> : vector<8x8xf32>
      %27 = tpu.matmul %25, %26, %cst {dimension_numbers = #tpu.dot_dimension_numbers<[1], [1], [0], [0], [0, 0, 1, 0], [], []>} : vector<8x16xf32>, vector<8x16xf32>, vector<8x8xf32> -> vector<8x8xf32>
      %28 = arith.mulf %8, %27 : vector<8x8xf32>
      %cst_23 = arith.constant -1.000000e+10 : f32
      %29 = vector.broadcast %cst_23 : f32 to vector<8x8xf32>
      %30 = arith.select %12, %29, %28 : vector<8x8xi1>, vector<8x8xf32>
      %c0_24 = arith.constant 0 : index
      %c0_25 = arith.constant 0 : index
      %c0_26 = arith.constant 0 : index
      %31 = vector.load %arg14[%c0_24, %c0_25, %c0_26] : memref<2x8x1xf32, #tpu.memory_space<vmem>>, vector<1x8x1xf32>
      %32 = vector.shape_cast %31 : vector<1x8x1xf32> to vector<8x1xf32>
      %33 = vector.broadcast %32 : vector<8x1xf32> to vector<8x8xf32>
      %34 = arith.subf %30, %33 : vector<8x8xf32>
      %35 = math.exp %34 : vector<8x8xf32>
      %c0_27 = arith.constant 0 : index
      %c0_28 = arith.constant 0 : index
      %c0_29 = arith.constant 0 : index
      %36 = vector.load %arg15[%c0_27, %c0_28, %c0_29] : memref<2x8x1xf32, #tpu.memory_space<vmem>>, vector<1x8x1xf32>
      %37 = vector.shape_cast %36 : vector<1x8x1xf32> to vector<8x1xf32>
      %38 = vector.broadcast %37 : vector<8x1xf32> to vector<8x8xf32>
      %39 = arith.divf %35, %38 : vector<8x8xf32>
      %c0_30 = arith.constant 0 : index
      %c0_31 = arith.constant 0 : index
      %c0_32 = arith.constant 0 : index
      %c0_33 = arith.constant 0 : index
      %40 = vector.load %arg13[%c0_30, %c0_31, %c0_32, %c0_33] : memref<1x2x8x8xf32, #tpu.memory_space<vmem>>, vector<1x1x8x8xf32>
      %41 = vector.shape_cast %40 : vector<1x1x8x8xf32> to vector<8x8xf32>
      %42 = vector.shape_cast %39 : vector<8x8xf32> to vector<1x1x8x8xf32>
      tpu.vector_store %arg13[%c0_30, %c0_31, %c0_32, %c0_33], %42 {strides = array<i32>} : memref<1x2x8x8xf32, #tpu.memory_space<vmem>>, vector<1x1x8x8xf32>,
      %43 = vector.extract_strided_slice %24 {offsets = [0, 0], sizes = [8, 16], strides = [1, 1]} : vector<8x32xf32> to vector<8x16xf32>
      %c0_34 = arith.constant 0 : index
      %c0_35 = arith.constant 0 : index
      %c0_36 = arith.constant 0 : index
      %44 = vector.load %arg16[%c0_34, %c0_35, %c0_36] : memref<2x8x16xf32, #tpu.memory_space<vmem>>, vector<1x8x16xf32>
      %45 = vector.shape_cast %44 : vector<1x8x16xf32> to vector<8x16xf32>
      %cst_37 = arith.constant dense<0.000000e+00> : vector<8x16xf32>
      %46 = tpu.matmul %39, %43, %cst_37 {dimension_numbers = #tpu.dot_dimension_numbers<[1], [0], [0], [1], [0, 0, 1, 1], [], []>} : vector<8x8xf32>, vector<8x16xf32>, vector<8x16xf32> -> vector<8x16xf32>
      %47 = arith.addf %45, %46 : vector<8x16xf32>
      %c0_38 = arith.constant 0 : index
      %c0_39 = arith.constant 0 : index
      %c0_40 = arith.constant 0 : index
      %48 = vector.load %arg16[%c0_38, %c0_39, %c0_40] : memref<2x8x16xf32, #tpu.memory_space<vmem>>, vector<1x8x16xf32>
      %49 = vector.shape_cast %48 : vector<1x8x16xf32> to vector<8x16xf32>
      %50 = vector.shape_cast %47 : vector<8x16xf32> to vector<1x8x16xf32>
      tpu.vector_store %arg16[%c0_38, %c0_39, %c0_40], %50 {strides = array<i32>} : memref<2x8x16xf32, #tpu.memory_space<vmem>>, vector<1x8x16xf32>,
      %51 = vector.extract_strided_slice %14 {offsets = [0, 16], sizes = [8, 16], strides = [1, 1]} : vector<8x32xf32> to vector<8x16xf32>
      %52 = vector.extract_strided_slice %16 {offsets = [0, 16], sizes = [8, 16], strides = [1, 1]} : vector<8x32xf32> to vector<8x16xf32>
      %cst_41 = arith.constant dense<0.000000e+00> : vector<8x8xf32>
      %53 = tpu.matmul %51, %52, %cst_41 {dimension_numbers = #tpu.dot_dimension_numbers<[1], [1], [0], [0], [0, 0, 1, 0], [], []>} : vector<8x16xf32>, vector<8x16xf32>, vector<8x8xf32> -> vector<8x8xf32>
      %54 = arith.mulf %8, %53 : vector<8x8xf32>
      %cst_42 = arith.constant -1.000000e+10 : f32
      %55 = vector.broadcast %cst_42 : f32 to vector<8x8xf32>
      %56 = arith.select %12, %55, %54 : vector<8x8xi1>, vector<8x8xf32>
      %c1 = arith.constant 1 : index
      %c0_43 = arith.constant 0 : index
      %c0_44 = arith.constant 0 : index
      %57 = vector.load %arg14[%c1, %c0_43, %c0_44] : memref<2x8x1xf32, #tpu.memory_space<vmem>>, vector<1x8x1xf32>
      %58 = vector.shape_cast %57 : vector<1x8x1xf32> to vector<8x1xf32>
      %59 = vector.broadcast %58 : vector<8x1xf32> to vector<8x8xf32>
      %60 = arith.subf %56, %59 : vector<8x8xf32>
      %61 = math.exp %60 : vector<8x8xf32>
      %c1_45 = arith.constant 1 : index
      %c0_46 = arith.constant 0 : index
      %c0_47 = arith.constant 0 : index
      %62 = vector.load %arg15[%c1_45, %c0_46, %c0_47] : memref<2x8x1xf32, #tpu.memory_space<vmem>>, vector<1x8x1xf32>
      %63 = vector.shape_cast %62 : vector<1x8x1xf32> to vector<8x1xf32>
      %64 = vector.broadcast %63 : vector<8x1xf32> to vector<8x8xf32>
      %65 = arith.divf %61, %64 : vector<8x8xf32>
      %c0_48 = arith.constant 0 : index
      %c1_49 = arith.constant 1 : index
      %c0_50 = arith.constant 0 : index
      %c0_51 = arith.constant 0 : index
      %66 = vector.load %arg13[%c0_48, %c1_49, %c0_50, %c0_51] : memref<1x2x8x8xf32, #tpu.memory_space<vmem>>, vector<1x1x8x8xf32>
      %67 = vector.shape_cast %66 : vector<1x1x8x8xf32> to vector<8x8xf32>
      %68 = vector.shape_cast %65 : vector<8x8xf32> to vector<1x1x8x8xf32>
      tpu.vector_store %arg13[%c0_48, %c1_49, %c0_50, %c0_51], %68 {strides = array<i32>} : memref<1x2x8x8xf32, #tpu.memory_space<vmem>>, vector<1x1x8x8xf32>,
      %69 = vector.extract_strided_slice %24 {offsets = [0, 16], sizes = [8, 16], strides = [1, 1]} : vector<8x32xf32> to vector<8x16xf32>
      %c1_52 = arith.constant 1 : index
      %c0_53 = arith.constant 0 : index
      %c0_54 = arith.constant 0 : index
      %70 = vector.load %arg16[%c1_52, %c0_53, %c0_54] : memref<2x8x16xf32, #tpu.memory_space<vmem>>, vector<1x8x16xf32>
      %71 = vector.shape_cast %70 : vector<1x8x16xf32> to vector<8x16xf32>
      %cst_55 = arith.constant dense<0.000000e+00> : vector<8x16xf32>
      %72 = tpu.matmul %65, %69, %cst_55 {dimension_numbers = #tpu.dot_dimension_numbers<[1], [0], [0], [1], [0, 0, 1, 1], [], []>} : vector<8x8xf32>, vector<8x16xf32>, vector<8x16xf32> -> vector<8x16xf32>
      %73 = arith.addf %71, %72 : vector<8x16xf32>
      %c1_56 = arith.constant 1 : index
      %c0_57 = arith.constant 0 : index
      %c0_58 = arith.constant 0 : index
      %74 = vector.load %arg16[%c1_56, %c0_57, %c0_58] : memref<2x8x16xf32, #tpu.memory_space<vmem>>, vector<1x8x16xf32>
      %75 = vector.shape_cast %74 : vector<1x8x16xf32> to vector<8x16xf32>
      %76 = vector.shape_cast %73 : vector<8x16xf32> to vector<1x8x16xf32>
      tpu.vector_store %arg16[%c1_56, %c0_57, %c0_58], %76 {strides = array<i32>} : memref<2x8x16xf32, #tpu.memory_space<vmem>>, vector<1x8x16xf32>,
      %c0_i32_59 = arith.constant 0 : i32
      %77 = arith.cmpi eq, %arg4, %c0_i32_59 : i32
      %78 = arith.extui %77 : i1 to i32
      %c0_i32_60 = arith.constant 0 : i32
      %79 = arith.cmpi ne, %78, %c0_i32_60 : i32
      scf.if %79 {
        %c0_61 = arith.constant 0 : index
        %c0_62 = arith.constant 0 : index
        %c0_63 = arith.constant 0 : index
        %80 = vector.load %arg8[%c0_61, %c0_62, %c0_63] : memref<1x32x32xf32, #tpu.memory_space<vmem>>, vector<1x32x32xf32>
        %81 = vector.shape_cast %80 : vector<1x32x32xf32> to vector<32x32xf32>
        %c0_64 = arith.constant 0 : index
        %c0_65 = arith.constant 0 : index
        %c0_66 = arith.constant 0 : index
        %82 = vector.load %arg12[%c0_64, %c0_65, %c0_66] : memref<1x8x32xf32, #tpu.memory_space<vmem>>, vector<1x8x32xf32>
        %83 = vector.shape_cast %82 : vector<1x8x32xf32> to vector<8x32xf32>
        %c0_67 = arith.constant 0 : index
        %c0_68 = arith.constant 0 : index
        %c0_69 = arith.constant 0 : index
        %84 = vector.load %arg16[%c0_67, %c0_68, %c0_69] : memref<2x8x16xf32, #tpu.memory_space<vmem>>, vector<1x8x16xf32>
        %85 = vector.shape_cast %84 : vector<1x8x16xf32> to vector<8x16xf32>
        %86 = vector.extract_strided_slice %81 {offsets = [0, 0], sizes = [16, 32], strides = [1, 1]} : vector<32x32xf32> to vector<16x32xf32>
        %cst_70 = arith.constant dense<0.000000e+00> : vector<8x32xf32>
        %87 = tpu.matmul %85, %86, %cst_70 {dimension_numbers = #tpu.dot_dimension_numbers<[1], [0], [0], [1], [0, 0, 1, 1], [], []>} : vector<8x16xf32>, vector<16x32xf32>, vector<8x32xf32> -> vector<8x32xf32>
        %88 = arith.addf %83, %87 : vector<8x32xf32>
        %c1_71 = arith.constant 1 : index
        %c0_72 = arith.constant 0 : index
        %c0_73 = arith.constant 0 : index
        %89 = vector.load %arg16[%c1_71, %c0_72, %c0_73] : memref<2x8x16xf32, #tpu.memory_space<vmem>>, vector<1x8x16xf32>
        %90 = vector.shape_cast %89 : vector<1x8x16xf32> to vector<8x16xf32>
        %91 = vector.extract_strided_slice %81 {offsets = [16, 0], sizes = [16, 32], strides = [1, 1]} : vector<32x32xf32> to vector<16x32xf32>
        %cst_74 = arith.constant dense<0.000000e+00> : vector<8x32xf32>
        %92 = tpu.matmul %90, %91, %cst_74 {dimension_numbers = #tpu.dot_dimension_numbers<[1], [0], [0], [1], [0, 0, 1, 1], [], []>} : vector<8x16xf32>, vector<16x32xf32>, vector<8x32xf32> -> vector<8x32xf32>
        %93 = arith.addf %88, %92 : vector<8x32xf32>
        %c0_75 = arith.constant 0 : index
        %c0_76 = arith.constant 0 : index
        %c0_77 = arith.constant 0 : index
        %94 = vector.load %arg12[%c0_75, %c0_76, %c0_77] : memref<1x8x32xf32, #tpu.memory_space<vmem>>, vector<1x8x32xf32>
        %95 = vector.shape_cast %94 : vector<1x8x32xf32> to vector<8x32xf32>
        %96 = vector.shape_cast %93 : vector<8x32xf32> to vector<1x8x32xf32>
        tpu.vector_store %arg12[%c0_75, %c0_76, %c0_77], %96 {strides = array<i32>} : memref<1x8x32xf32, #tpu.memory_space<vmem>>, vector<1x8x32xf32>,
      } else {
      }
    } else {
    }
    return
  }
  func.func @transform_0(%arg0: i32, %arg1: i32, %arg2: i32, %arg3: i32, %arg4: i32) -> (i32, i32, i32, i32) {
    %c0_i32 = arith.constant 0 : i32
    %c0_i32_0 = arith.constant 0 : i32
    return %arg0, %arg2, %arg1, %c0_i32 : i32, i32, i32, i32
  }
  func.func @transform_1(%arg0: i32, %arg1: i32, %arg2: i32, %arg3: i32, %arg4: i32) -> (i32, i32, i32, i32) {
    %c0_i32 = arith.constant 0 : i32
    %c0_i32_0 = arith.constant 0 : i32
    return %arg0, %arg2, %arg4, %c0_i32 : i32, i32, i32, i32
  }
  func.func @transform_2(%arg0: i32, %arg1: i32, %arg2: i32, %arg3: i32, %arg4: i32) -> (i32, i32, i32, i32) {
    %0 = arith.muli %arg4, %arg3 : i32
    %c0_i32 = arith.constant 0 : i32
    %c0_i32_0 = arith.constant 0 : i32
    return %arg0, %arg2, %0, %c0_i32 : i32, i32, i32, i32
  }
  func.func @transform_3(%arg0: i32, %arg1: i32, %arg2: i32, %arg3: i32, %arg4: i32) -> (i32, i32, i32) {
    %c0_i32 = arith.constant 0 : i32
    %c0_i32_0 = arith.constant 0 : i32
    %c0_i32_1 = arith.constant 0 : i32
    return %arg2, %c0_i32, %c0_i32_0 : i32, i32, i32
  }
  func.func @transform_4(%arg0: i32, %arg1: i32, %arg2: i32, %arg3: i32, %arg4: i32) -> (i32, i32, i32) {
    %c0_i32 = arith.constant 0 : i32
    return %arg0, %arg1, %arg4 : i32, i32, i32
  }
  func.func @transform_5(%arg0: i32, %arg1: i32, %arg2: i32, %arg3: i32, %arg4: i32) -> (i32, i32, i32) {
    %c0_i32 = arith.constant 0 : i32
    return %arg0, %arg1, %arg4 : i32, i32, i32
  }
  func.func @transform_6(%arg0: i32, %arg1: i32, %arg2: i32, %arg3: i32, %arg4: i32) -> (i32, i32, i32) {
    %c0_i32 = arith.constant 0 : i32
    %c0_i32_0 = arith.constant 0 : i32
    return %arg0, %arg1, %c0_i32 : i32, i32, i32
  }
  func.func @transform_7(%arg0: i32, %arg1: i32, %arg2: i32, %arg3: i32, %arg4: i32) -> (i32, i32, i32) {
    %c0_i32 = arith.constant 0 : i32
    %c0_i32_0 = arith.constant 0 : i32
    return %arg0, %arg1, %c0_i32 : i32, i32, i32
  }
  func.func @transform_8(%arg0: i32, %arg1: i32, %arg2: i32, %arg3: i32, %arg4: i32) -> (i32, i32, i32, i32) {
    %0 = arith.muli %arg4, %arg3 : i32
    %c0_i32 = arith.constant 0 : i32
    return %arg0, %arg2, %arg1, %0 : i32, i32, i32, i32
  }
}

</mosaic_0001>

<bundles_post_ra>
// kernel: distance_attention.2
= control target key start
LH: loop header
LB: loop body
LE: loop exit
PB: predicated region body
PF: predicated region fallthrough
CT: control target
= control target key end

     0   :  { %s1717_s0 = inlined_call_operand.vmem [shape: f32[2,8,32], index: 0, kind: input, shape index: {}]   ;;  %s1718_s1 = inlined_call_operand.hbm [shape: f32[2,8,32], index: 1, kind: input, shape index: {}]   ;;  %s1719_s2 = inlined_call_operand.hbm [shape: f32[2,8,32], index: 2, kind: input, shape index: {}]   ;;  %s1720_s3 = inlined_call_operand.hbm [shape: f32[32,32], index: 3, kind: input, shape index: {}]   ;;  %s1721_s4 = inlined_call_operand.hbm [shape: f32[32,32], index: 4, kind: input, shape index: {}]   ;;  %s1722_s5 = inlined_call_operand.hbm [shape: f32[32,32], index: 5, kind: input, shape index: {}]   ;;  %s1723_s6 = inlined_call_operand.vmem [shape: f32[2,1,8,32], index: 6, kind: output, shape index: {0}]   ;;  %s1724_s7 = inlined_call_operand.vmem [shape: f32[2,1,8,32], index: 7, kind: output, shape index: {1}]   ;;  %s1725_s8 = inlined_call_operand.vmem [shape: f32[2,1,8,32], index: 8, kind: output, shape index: {2}]  }
   0x1   :  { %1731 = sst [smem:[#allocation14_spill]] %s1720_s3 }
   0x2   :  { %1732 = sst [smem:[#allocation15_spill]] %s1721_s4 }
   0x3   :  { %1733 = sst [smem:[#allocation16_spill]] %s1724_s7 }
   0x4   :  { %1734 = sst [smem:[#allocation17_spill]] %s1725_s8 }
   0x5   :  { %14 = vsyncpa [#allocation3], 0 }
   0x6   :  { %16 = vsyncpa [#allocation3 + $0x1], 0 }
   0x7   :  { %17 = vsyncpa [#allocation5], 0 }
   0x8   :  { %19 = vsyncpa [#allocation5 + $0x1], 0 }
   0x9   :  { %20 = vsyncpa [#allocation8], 0  ;;  %s1415_s27 = smov 0   ;;  %s1417_s28 = smov 0  }
   0xa   :  { %s1419_s29 = smov 0   ;;  %s1421_s30 = smov 0  }
   0xb   :  { %s1423_s9 = smov 0   ;;  %s1425_s10 = smov 0  }
   0xc LB: > { %s1728_s11 = sadd.s32 4294967295, %s1358_s10   ;;  %p88_p0 = scmp.ne.s32.totalorder %s1342_s28, %s1338_s27  ;;  %s1358_s10 = sphi %s1425_s10, %s26_s10   ;;  %s1354_s9 = sphi %s1423_s9, %s1753_s9   ;;  %s1350_s30 = sphi %s1421_s30, %s1752_s30   ;;  %s1346_s29 = sphi %s1419_s29, %s1751_s29   ;;  %s1342_s28 = sphi %s1417_s28, %s1750_s28   ;;  %s1338_s27 = sphi %s1415_s27, %s1749_s27  }
   0xd   : > { %p1447_p1 = scmp.eq.s32.totalorder %s1728_s11, 0  ;;  %p966_p2 = scmp.ge.s32.totalorder %s1358_s10, 1 }
   0xe   : > { %p274_p3 = scmp.lt.s32.totalorder %s1358_s10, 3  ;;  %s1360_s15 = smov [#allocation6]  }
   0xf   : > { %s1735_s12 = scalar_select %p1447_p1, 1, 0 }
  0x10   : > { %p1455_p4 = por %p1447_p1, %p88_p0  ;;  %p1459_p5 = pnand %p966_p2, %p274_p3 }
  0x11   : > { %s286_s16 = sshll.u32 %s1360_s15, 4  ;;  %s1361_s18 = smov [#allocation7]   ;;  %s1463_s16 = int_to_ptr.vmem [resolvable:$true] %s286_s16 }
  0x12   : > { %s1736_s13 = scalar_select %p1455_p4, 1, 0 }
  0x13   : > { %s1737_s14 = scalar_select %p1459_p5, 1, 0 }
  0x14   : > { %p1072_p6 = pneg %p1459_p5  ;;  %s299_s19 = sshll.u32 %s1361_s18, 4  ;;  %s1473_s19 = int_to_ptr.vmem [resolvable:$true] %s299_s19 }
  0x15   : > { %s1362_s20 = smov [#allocation9]   ;;  %s1739_s3 = sld [smem:[#allocation14_spill]] }
  0x16   : > { %p1469_p7 = pnand %p1072_p6, %p1447_p1  ;;  %s1475_s21 = sshll.u32 %s1362_s20, 4  ;;  %s313_s21 = int_to_ptr.vmem [resolvable:$true] %s1475_s21 }
  0x18   : > { %p1485_p9 = pneg %p1469_p7 }
  0x1b   : > { %s1152_s24 = scalar_lea.hbm %s1739_s3, 512 }
  0x1c   : > { %p1153_p8 = scmp.ne.s32.totalorder %s1739_s3, %s1152_s24  ;;  %p1159_p12 = scmp.lt.u32.totalorder %s1152_s24, %s1739_s3 }
  0x1e   : > { %p1155_p10 = pnand %p1485_p9, %p1153_p8 }
  0x20   : > { %p1156_p11 = pneg %p1155_p10 }
  0x22   : > { %p1161_p13 = pnand %p1159_p12, %p1156_p11 }
  0x24   : > { %1164 = shalt.err (!%p1161_p13)
}
  0x25   : > { %s1165_s20 = scalar_lea.vmem %s1463_s16, 512  ;;  %p1173_p6 = scmp.lt.s32.totalorder %s1463_s16, %s1463_s16 }
  0x26   : > { %p1166_p0 = scmp.ne.s32.totalorder %s1463_s16, %s1165_s20  ;;  %p1174_p1 = scmp.lt.s32.totalorder %s1165_s20, %s1165_s20 }
  0x28   : > { %p1168_p2 = pnand %p1166_p0, %p1485_p9  ;;  %p1175_p8 = por %p1174_p1, %p1173_p6 }
  0x2a   : > { %p1169_p3 = pneg %p1168_p2 }
  0x2c   : > { %p1176_p10 = pnand %p1175_p8, %p1169_p3 }
  0x2e   : > { %1179 = shalt.err (!%p1176_p10)
}
  0x2f   : > { %s1363_s22 = smov 128   ;;  %s1364_s23 = smov 8  }
  0x30   : > { %1075 = dma.hbm_to_vmem [thread:$0]  (!%p1469_p7), %s1739_s3, 512, %s1463_s16, [#allocation5], %s1363_s22, %s1363_s22, %s1364_s23  }
  0x31   : > { %s1741_s4 = sld [smem:[#allocation15_spill]] }
  0x37   : > { %s1180_s18 = scalar_lea.hbm %s1741_s4, 512 }
  0x38   : > { %p1181_p1 = scmp.ne.s32.totalorder %s1741_s4, %s1180_s18  ;;  %p1187_p13 = scmp.lt.u32.totalorder %s1180_s18, %s1741_s4 }
  0x3a   : > { %p1183_p11 = pnand %p1181_p1, %p1485_p9 }
  0x3c   : > { %p1184_p12 = pneg %p1183_p11 }
  0x3e   : > { %p1189_p0 = pnand %p1187_p13, %p1184_p12 }
  0x40   : > { %1192 = shalt.err (!%p1189_p0)
}
  0x41   : > { %s1193_s16 = scalar_lea.vmem %s1473_s19, 512  ;;  %p1201_p8 = scmp.lt.s32.totalorder %s1473_s19, %s1473_s19 }
  0x42   : > { %p1194_p2 = scmp.ne.s32.totalorder %s1473_s19, %s1193_s16  ;;  %p1202_p10 = scmp.lt.s32.totalorder %s1193_s16, %s1193_s16 }
  0x44   : > { %p1196_p3 = pnand %p1194_p2, %p1485_p9  ;;  %p1203_p1 = por %p1202_p10, %p1201_p8 }
  0x46   : > { %p1197_p6 = pneg %p1196_p3 }
  0x48   : > { %p1204_p11 = pnand %p1203_p1, %p1197_p6 }
  0x4a   : > { %1207 = shalt.err (!%p1204_p11)
}
  0x4b   : > { %1078 = dma.hbm_to_vmem [thread:$0]  (!%p1469_p7), %s1741_s4, 512, %s1473_s19, [#allocation8], %s1363_s22, %s1363_s22, %s1364_s23  }
  0x4c   : > { %s1208_s25 = scalar_lea.hbm %s1722_s5, 512 }
  0x4d   : > { %p1209_p12 = scmp.ne.s32.totalorder %s1722_s5, %s1208_s25  ;;  %p1215_p2 = scmp.lt.u32.totalorder %s1208_s25, %s1722_s5 }
  0x4f   : > { %p1211_p13 = pnand %p1209_p12, %p1485_p9 }
  0x51   : > { %p1212_p0 = pneg %p1211_p13 }
  0x53   : > { %p1217_p3 = pnand %p1215_p2, %p1212_p0 }
  0x55   : > { %1220 = shalt.err (!%p1217_p3)
}
  0x56   : > { %s1221_s16 = scalar_lea.vmem %s313_s21, 512  ;;  %p1229_p1 = scmp.lt.s32.totalorder %s313_s21, %s313_s21 }
  0x57   : > { %p1222_p6 = scmp.ne.s32.totalorder %s313_s21, %s1221_s16  ;;  %p1230_p11 = scmp.lt.s32.totalorder %s1221_s16, %s1221_s16 }
  0x59   : > { %p1224_p8 = pnand %p1222_p6, %p1485_p9  ;;  %p1231_p4 = por %p1230_p11, %p1229_p1 }
  0x5b   : > { %p1225_p10 = pneg %p1224_p8 }
  0x5d   : > { %p1232_p5 = pnand %p1231_p4, %p1225_p10 }
  0x5f   : > { %1235 = shalt.err (!%p1232_p5)
}
  0x60   : > { %1081 = dma.hbm_to_vmem [thread:$0]  (!%p1469_p7), %s1722_s5, 512, %s313_s21, [#allocation8], %s1363_s22, %s1363_s22, %s1364_s23  }
  0x61   : > { %s75_s27 = sadd.s32 1, %s1346_s29  ;;  %s38_s8 = sadd.s32 1, %s1354_s9 }
  0x62   : > { %p82_p4 = scmp.ne.s32.totalorder %s1346_s29, %s1342_s28  ;;  %p40_p5 = scmp.ge.s32.totalorder %s38_s8, 2 }
  0x63   : > { %p83_p9 = scmp.eq.s32.totalorder %s1358_s10, 0  ;;  %p1092_p12 = scmp.lt.s32.totalorder %s1358_s10, 2 }
  0x64   : > { %s336_s17 = sand.u32 1, %s1346_s29   ;;  %s1755_s8 = smov (%p40_p5, %s38_s8), 0 }
  0x65   : > { %p84_p13 = por %p83_p9, %p82_p4  ;;  %s70_s11 = ssub.s32 %s1354_s9, %s1755_s8 }
  0x66   : > { %s1568_s24 = sshll.u32 %s336_s17, 3  ;;  %p73_p0 = scmp.eq.s32.totalorder %s70_s11, 0 }
  0x67   : > { %s972_s21 = sshll.u32 %s1354_s9, 7  ;;  %s340_s22 = scalar_lea.vmem [#allocation2], %s1568_s24 }
  0x68   : > { %s348_s23 = sshll.u32 %s340_s22, 4  ;;  %s1578_s18 = scalar_lea.hbm %s1718_s1, %s972_s21  ;;  %s1580_s23 = int_to_ptr.vmem [resolvable:$true] %s348_s23 }
  0x69   : > { %s1573_s25 = scalar_select %p73_p0, %s1346_s29, %s75_s27  }
  0x6a   : > { %p1584_p7 = pnand %p1092_p12, %p84_p13  ;;  %s1591_s7 = scalar_lea.hbm %s1719_s2, %s972_s21 }
  0x6b   : > { %s355_s27 = sand.u32 1, %s1358_s10   ;;  %s337_s11 = scalar_lea.sflag [#allocation3], %s336_s17 }
  0x6c   : > { %s1236_s22 = scalar_lea.hbm %s1578_s18, 128  ;;  %p1238_p3 = pneg %p1584_p7 }
  0x6d   : > { %p1237_p2 = scmp.ne.s32.totalorder %s1578_s18, %s1236_s22  ;;  %s1241_s3 = scalar_lea.hbm %s1718_s1, 256 }
  0x6e   : > { %p1242_p10 = scmp.lt.u32.totalorder %s1578_s18, %s1718_s1  ;;  %p1243_p1 = scmp.lt.u32.totalorder %s1241_s3, %s1236_s22 }
  0x6f   : > { %p1239_p6 = pnand %p1238_p3, %p1237_p2  ;;  %p1245_p4 = scmp.lt.u32.totalorder %s1236_s22, %s1578_s18 }
  0x70   : > { %p1244_p11 = por %p1243_p1, %p1242_p10 }
  0x71   : > { %p1240_p8 = pneg %p1239_p6 }
  0x72   : > { %p1246_p5 = por %p1245_p4, %p1244_p11 }
  0x74   : > { %p1247_p9 = pnand %p1246_p5, %p1240_p8 }
  0x76   : > { %1250 = shalt.err (!%p1247_p9)
}
  0x77   : > { %s1251_s17 = scalar_lea.vmem %s1580_s23, 128  ;;  %s1365_s21 = smov [#allocation2]  }
  0x78   : > { %p1252_p12 = scmp.ne.s32.totalorder %s1580_s23, %s1251_s17  ;;  %s1256_s19 = sshll.u32 %s1365_s21, 4  ;;  %s1257_s19 = int_to_ptr.vmem [resolvable:$false] %s1256_s19 }
  0x79   : > { %s1258_s4 = scalar_lea.vmem %s1257_s19, 256  ;;  %p1259_p2 = scmp.lt.s32.totalorder %s1580_s23, %s1257_s19 }
  0x7a   : > { %p1254_p13 = pnand %p1252_p12, %p1238_p3  ;;  %p1260_p6 = scmp.lt.s32.totalorder %s1258_s4, %s1251_s17 }
  0x7c   : > { %p1255_p0 = pneg %p1254_p13  ;;  %p1261_p10 = por %p1260_p6, %p1259_p2 }
  0x7e   : > { %p1262_p1 = pnand %p1261_p10, %p1255_p0 }
  0x80   : > { %1265 = shalt.err (!%p1262_p1)
}
  0x81   : > { %1085 = dma.hbm_to_vmem [thread:$0]  (!%p1584_p7), %s1578_s18, 128, %s1580_s23, %s337_s11  }
  0x82   : > { %s359_s3 = scalar_lea.vmem [#allocation4], %s1568_s24  ;;  %s356_s26 = scalar_lea.sflag [#allocation5], %s355_s27 }
  0x83   : > { %s367_s22 = sshll.u32 %s359_s3, 4  ;;  %s1266_s15 = scalar_lea.hbm %s1591_s7, 128  ;;  %s368_s22 = int_to_ptr.vmem [resolvable:$true] %s367_s22 }
  0x84   : > { %p1267_p8 = scmp.ne.s32.totalorder %s1591_s7, %s1266_s15  ;;  %s1271_s21 = scalar_lea.hbm %s1719_s2, 256 }
  0x85   : > { %p1272_p5 = scmp.lt.u32.totalorder %s1591_s7, %s1719_s2  ;;  %p1273_p9 = scmp.lt.u32.totalorder %s1271_s21, %s1266_s15 }
  0x86   : > { %p1269_p11 = pnand %p1267_p8, %p1238_p3  ;;  %p1275_p13 = scmp.lt.u32.totalorder %s1266_s15, %s1591_s7 }
  0x87   : > { %p1274_p12 = por %p1273_p9, %p1272_p5 }
  0x88   : > { %p1270_p4 = pneg %p1269_p11 }
  0x89   : > { %p1276_p0 = por %p1275_p13, %p1274_p12 }
  0x8b   : > { %p1277_p2 = pnand %p1276_p0, %p1270_p4 }
  0x8d   : > { %1280 = shalt.err (!%p1277_p2)
}
  0x8e   : > { %s1281_s24 = scalar_lea.vmem %s368_s22, 128  ;;  %s1366_s23 = smov [#allocation4]  }
  0x8f   : > { %p1282_p6 = scmp.ne.s32.totalorder %s368_s22, %s1281_s24  ;;  %s1286_s18 = sshll.u32 %s1366_s23, 4  ;;  %s1287_s18 = int_to_ptr.vmem [resolvable:$false] %s1286_s18 }
  0x90   : > { %s1288_s27 = scalar_lea.vmem %s1287_s18, 256  ;;  %p1289_p8 = scmp.lt.s32.totalorder %s368_s22, %s1287_s18 }
  0x91   : > { %p1284_p10 = pnand %p1282_p6, %p1238_p3  ;;  %p1290_p11 = scmp.lt.s32.totalorder %s1288_s27, %s1281_s24 }
  0x93   : > { %p1285_p1 = pneg %p1284_p10  ;;  %p1291_p5 = por %p1290_p11, %p1289_p8 }
  0x95   : > { %p1292_p9 = pnand %p1291_p5, %p1285_p1 }
  0x97   : > { %1295 = shalt.err (!%p1292_p9)
}
  0x98   : > { %1088 = dma.hbm_to_vmem [thread:$0]  (!%p1584_p7), %s1591_s7, 128, %s368_s22, %s356_s26  }
  0x99   : > { %p1743_p4 = scmp.ne.s32.totalorder %s1737_s14, 0 }
  0x9a   : > { %s378_s11 = sand.u32 (!%p1743_p4), 1, %s1342_s28   ;;  %p1744_p3 = scmp.ne.s32.totalorder (!%p1743_p4), %s1736_s13, 0 }
  0x9b   : > { %376 = sbr.rel (%p1743_p4) target bundleno = 404 (0x194), region = 44  ;;  %s1644_s3 = sshll.u32 (!%p1743_p4), %s378_s11, 3 }
  0x9c   : > { %s379_s15 = scalar_lea.sflag (!%p1743_p4), [#allocation3], %s378_s11  ;;  %s382_s16 = scalar_lea.vmem (!%p1743_p4), [#allocation2], %s1644_s3 }
  0xa2   : > { %1321 = dma.done.wait (%p1744_p3), %s379_s15, 128  }
  0xa3   : > { %1323 = vsyncadd (%p1744_p3), %s379_s15, 4294967168  ;;  %s1745_s20 = sadd.s32 4294967295, %s1358_s10   ;;  %s391_s22 = scalar_lea.vmem [#allocation4], %s1644_s3 }
  0xa4   : > { %s387_s7 = sand.u32 1, %s1745_s20  }
  0xa5   : > { %s388_s14 = scalar_lea.sflag [#allocation5], %s387_s7 }
  0xa6   : > { %1325 = dma.done.wait (%p1744_p3), %s388_s14, 128  }
  0xa7   : > { %1327 = vsyncadd (%p1744_p3), %s388_s14, 4294967168  ;;  %p1746_p7 = scmp.ne.s32.totalorder %s1735_s12, 0 }
  0xa9   : > { %1329 = dma.done.wait (%p1746_p7), [#allocation5], 512  }
  0xaa   : > { %1331 = vsyncadd (%p1746_p7), [#allocation5], 4294966784 }
  0xab   : > { %1333 = dma.done.wait (%p1746_p7), [#allocation8], 1024  }
  0xac   : > { %1335 = vsyncadd (%p1746_p7), [#allocation8], 4294966272  ;;  %p464_p12 = scmp.lt.s32.totalorder %s1350_s30, 1  ;;  %v1367_v0 = vmov 0.0|0.0   ;;  %vm1368_vm0 = vmmov 0   ;;  %v1369_v1 = vmov 0.0  }
  0xad   : > { %1038 = vmatprep.subr.bf16.mxu0 %v1367_v0  ;;  %1013 = vmatprep.mubr.msk.f32.mxu0 %vm1368_vm0, %v1369_v1  ;;  %v495_v2 = vld [vmem:[#allocation6] sm:$0xff]  ;;  %v496_v3 = vld [vmem:[#allocation6 + $0x8] sm:$0xff]  ;;  %v497_v4 = vld [vmem:[#allocation6 + $0x10] sm:$0xff]  ;;  %vm507_vm1 = vcmask 261120   ;;  %s1747_s23 = sld [smem:[#allocation16_spill]]  ;;  %s1748_s3 = sld [smem:[#allocation17_spill]] }
  0xae   : > { %1044 = vmatprep.subr.bf16.mxu1 %v1367_v0  ;;  %1024 = vmatprep.mubr.msk.f32.mxu1 %vm1368_vm0, %v1369_v1  ;;  %s1757_s30 = smov (!%p464_p12, %s1350_s30), 1  ;;  %v1039_v5 = vpack.c.bf16 %v496_v3, %v495_v2  ;;  %v498_v6 = vld [vmem:[#allocation6 + $0x18] sm:$0xff]  ;;  %v499_v7 = vld [vmem:[#allocation7] sm:$0xff]  ;;  %v500_v8 = vld [vmem:[#allocation7 + $0x8] sm:$0xff] }
  0xaf   : > { %s1670_s12 = sshll.u32 %s1757_s30, 3  ;;  %v1042_v9 = vpack.c.bf16 %v498_v6, %v497_v4  ;;  %v1045_v10 = vpack.c.bf16 %v500_v8, %v499_v7  ;;  %v501_v11 = vld [vmem:[#allocation7 + $0x10] sm:$0xff]  ;;  %v502_v12 = vld [vmem:[#allocation7 + $0x18] sm:$0xff]  ;;  %v503_v13 = vld [vmem:[#allocation9] sm:$0xff] }
  0xb0   : > { %1040 = vmatpush3.bf16.msra.mxu0 %v1039_v5  ;;  %s470_s17 = scalar_lea.vmem %s1717_s0, %s1670_s12  ;;  %v504_v14 = vld [vmem:[#allocation9 + $0x8] sm:$0xff]  ;;  %v1048_v15 = vpack.c.bf16 %v502_v12, %v501_v11  ;;  %v505_v18 = vld [vmem:[#allocation9 + $0x10] sm:$0xff]  ;;  %v506_v19 = vld [vmem:[#allocation9 + $0x18] sm:$0xff]  ;;  %s477_s19 = scalar_lea.vmem %s1723_s6, %s1670_s12 }
  0xb1   : > { %1041 = vmatprep.subr.bf16.mxu0 %v1367_v0  ;;  %1046 = vmatpush3.bf16.msra.mxu1 %v1045_v10  ;;  %v492_v16 = vld [vmem:[%s470_s17] sm:$0xff]  ;;  %v1051_v17 = vpack.c.bf16 %v504_v14, %v503_v13  ;;  %v1054_v21 = vpack.c.bf16 %v506_v19, %v505_v18  ;;  %v494_v22 = vld [vmem:[%s391_s22] sm:$0xff] }
  0xb2   : > { %1047 = vmatprep.subr.bf16.mxu1 %v1367_v0  ;;  %v493_v20 = vld [vmem:[%s382_s16] sm:$0xff] }
  0xb3   : > { %s484_s18 = scalar_lea.vmem %s1747_s23, %s1670_s12  ;;  %s491_s15 = scalar_lea.vmem %s1748_s3, %s1670_s12 }
  0xb4   : > { %1043 = vmatpush3.bf16.msra.mxu0 %v1042_v9 }
  0xb5   : > { %1050 = vmatprep.subr.bf16.mxu0 %v1367_v0  ;;  %1049 = vmatpush3.bf16.msra.mxu1 %v1048_v15 }
  0xb7   : > { %1014 = vmatmul.mubr.msk.f32.vlgmr.msra.gmra.mrb[0].mxu0 %vm507_vm1, %v492_v16 }
  0xb8   : > { %1052 = vmatpush3.bf16.msra.mxu0 %v1051_v17  ;;  %1035 = vmatprep.mubr.msk.f32.mxu0 %vm1368_vm0, %v1369_v1 }
  0xb9   : > { %1053 = vmatprep.subr.bf16.mxu0 %v1367_v0  ;;  %1025 = vmatmul.mubr.msk.f32.vlgmr.msra.gmra.mrb[0].mxu1 %vm507_vm1, %v493_v20 }
  0xbc   : > { %1055 = vmatpush3.bf16.msra.mxu0 %v1054_v21 }
  0xbf   : > { %1036 = vmatmul.mubr.msk.f32.vlgmr.msra.gmra.mrb[2].mxu0 %vm507_vm1, %v494_v22 }
 0x18a   : > { %v577_v23 = vpop.f32.mrb[0].mxu0 }
 0x18b   : > { %v581_v24 = vmul.f32 0.25, %v577_v23  ;;  %v1015_v25 = vpop.f32.mrb[1].mxu0 }
 0x18c   : > { %v651_v26 = vpop.f32.mrb[0].mxu1 }
 0x18d   : > { %728 = vst.msk [vmem:[%s477_s19] sm:$0xff] %vm507_vm1, %v581_v24  ;;  %729 = vst.msk [vmem:[%s484_s18] sm:$0xff] %vm507_vm1, %v651_v26  ;;  %v1026_v27 = vpop.f32.mrb[1].mxu1 }
 0x192   : > { %v724_v28 = vpop.f32.mrb[2].mxu0 }
 0x193   : > { %730 = vst.msk [vmem:[%s491_s15] sm:$0xff] %vm507_vm1, %v724_v28  ;;  %v1037_v29 = vpop.f32.mrb[3].mxu0 }
 0x194 PF: > { %s26_s10 = sadd.s32 1, %s1358_s10   ;;  %s1749_s27 = smov %s1342_s28 }
 0x195   : > { %p23_p13 = scmp.ge.s32.totalorder %s26_s10, 4   ;;  %s1750_s28 = smov %s1346_s29 }
 0x196   : > { %s1751_s29 = smov %s1573_s25  ;;  %s1752_s30 = smov %s1354_s9 }
 0x197   : > { %s1753_s9 = smov %s1755_s8  ;;  %25 = sbr.rel (!%p23_p13) target bundleno = 12 (0xc), region = 136 }
 0x19e   :  { %796 = vsyncpa [#allocation3], 1 }
 0x19f   :  { %798 = vsyncpa [#allocation3 + $0x1], 1 }
 0x1a0   :  { %799 = vsyncpa [#allocation5], 1 }
 0x1a1   :  { %801 = vsyncpa [#allocation5 + $0x1], 1 }
 0x1a2   :  { %802 = vsyncpa [#allocation8], 1 }

// kernel: distance_attention.3
= control target key start
LH: loop header
LB: loop body
LE: loop exit
PB: predicated region body
PF: predicated region fallthrough
CT: control target
= control target key end

     0   :  { %s2337_s0 = inlined_call_operand.vmem [shape: f32[2,1,8,32], index: 0, kind: input, shape index: {}]   ;;  %s2338_s1 = inlined_call_operand.vmem [shape: f32[2,1,8,32], index: 1, kind: input, shape index: {}]   ;;  %s2339_s2 = inlined_call_operand.vmem [shape: f32[2,1,8,32], index: 2, kind: input, shape index: {}]   ;;  %s2340_s3 = inlined_call_operand.vmem [shape: f32[1,32,32], index: 3, kind: input, shape index: {}]   ;;  %s2341_s4 = inlined_call_operand.vmem [shape: f32[2,8,8], index: 4, kind: input, shape index: {}]   ;;  %s2342_s5 = inlined_call_operand.vmem [shape: s8[2,8,8], index: 5, kind: input, shape index: {}]   ;;  %s2343_s6 = inlined_call_operand.vmem [shape: f32[2,8,32], index: 6, kind: input, shape index: {}]   ;;  %s2344_s7 = inlined_call_operand.hbm [shape: f32[2,8,32], index: 7, kind: output, shape index: {0}]   ;;  %s2345_s8 = inlined_call_operand.hbm [shape: f32[2,2,8,8], index: 8, kind: output, shape index: {1}]  }
   0x1   :  { %2359 = sst [smem:[#allocation22_spill]] %s2344_s7 }
   0x2   :  { %2360 = sst [smem:[#allocation23_spill]] %s2345_s8 }
   0x3   :  { %14 = vsyncpa [#allocation6], 0 }
   0x4   :  { %16 = vsyncpa [#allocation6 + $0x1], 0 }
   0x5   :  { %17 = vsyncpa [#allocation8], 0 }
   0x6   :  { %19 = vsyncpa [#allocation8 + $0x1], 0  ;;  %s2034_s27 = smov 0   ;;  %s2036_s28 = smov 0  }
   0x7   :  { %s2038_s29 = smov 0   ;;  %s2040_s30 = smov 0  }
   0x8   :  { %s2042_s9 = smov 0   ;;  %s2044_s10 = smov 0  }
   0x9   :  { %s2046_s11 = smov 0   ;;  %s2048_s12 = smov 0  }
   0xa LB: > { %2361 = sst [smem:[#allocation11_spill]] %s1945_s27  ;;  %s1627_s13 = sadd.s32 4294967295, %s1973_s12   ;;  %s1973_s12 = sphi %s2048_s12, %s25_s12   ;;  %s1969_s11 = sphi %s2046_s11, %s2390_s11   ;;  %s1965_s10 = sphi %s2044_s10, %s2389_s10   ;;  %s1961_s9 = sphi %s2042_s9, %s2388_s9   ;;  %s1957_s30 = sphi %s2040_s30, %s2387_s30   ;;  %s1953_s29 = sphi %s2038_s29, %s2386_s29   ;;  %s1949_s28 = sphi %s2036_s28, %s2385_s28   ;;  %s1945_s27 = sphi %s2034_s27, %s2384_s27  }
   0xb   : > { %2362 = sst [smem:[#allocation12_spill]] %s1949_s28  ;;  %s1628_s14 = sadd.s32 4294967294, %s1973_s12  }
   0xc   : > { %2363 = sst [smem:[#allocation13_spill]] %s1953_s29  ;;  %s46_s15 = sadd.s32 1, %s1965_s10 }
   0xd   : > { %2364 = sst [smem:[#allocation14_spill]] %s1965_s10  ;;  %p48_p0 = scmp.ge.s32.totalorder %s46_s15, 2 }
   0xe   : > { %2365 = sst [smem:[#allocation15_spill]] %s1969_s11  ;;  %s58_s16 = sadd.s32 1, %s1969_s11 }
   0xf   : > { %2366 = sst [smem:[#allocation16_spill]] %s1973_s12  ;;  %p283_p1 = scmp.ne.s32.totalorder %s1953_s29, %s1949_s28 }
  0x10   : > { %p284_p2 = scmp.eq.s32.totalorder %s1627_s13, 3  ;;  %s2392_s15 = smov (%p48_p0, %s46_s15), 0 }
  0x11   : > { %2367 = sst [smem:[#allocation17_spill]] %s2392_s15  ;;  %s2394_s16 = smov (!%p48_p0, %s58_s16), %s1969_s11 }
  0x12   : > { %p2083_p3 = por %p284_p2, %p283_p1  ;;  %p289_p4 = scmp.ne.s32.totalorder %s1949_s28, %s1945_s27 }
  0x13   : > { %p60_p5 = scmp.ge.s32.totalorder %s2394_s16, 2  ;;  %p290_p6 = scmp.eq.s32.totalorder %s1628_s14, 3 }
  0x14   : > { %s2368_s17 = scalar_select %p2083_p3, 1, 0 }
  0x15   : > { %p1632_p7 = scmp.ge.s32.totalorder %s1973_s12, 1  ;;  %p427_p8 = scmp.lt.s32.totalorder %s1973_s12, 5 }
  0x16   : > { %2369 = sst [smem:[#allocation18_spill]] %s2368_s17  ;;  %s2396_s16 = smov (%p60_p5, %s2394_s16), 0 }
  0x17   : > { %2370 = sst [smem:[#allocation19_spill]] %s2396_s16  ;;  %p2093_p9 = por %p290_p6, %p289_p4 }
  0x18   : > { %p428_p10 = pnand %p1632_p7, %p427_p8  ;;  %s268_s19 = ssub.s32 %s1969_s11, %s2396_s16 }
  0x19   : > { %s2371_s18 = scalar_select %p2093_p9, 1, 0 }
  0x1a   : > { %s273_s20 = sadd.s32 1, %s1953_s29  ;;  %p271_p11 = scmp.eq.s32.totalorder %s268_s19, 0 }
  0x1b   : > { %2372 = sst [smem:[#allocation20_spill]] %s2371_s18  ;;  %431 = sbr.rel (%p428_p10) target bundleno = 1654 (0x676), region = 48 }
  0x1c   : > { %s2101_s21 = scalar_select %p271_p11, %s1953_s29, %s273_s20  }
  0x1d   : > { %s2104_s22 = sand.u32 (!%p428_p10), 1, %s1949_s28   ;;  %p524_p12 = scmp.lt.s32.totalorder (!%p428_p10), %s1961_s9, 1 }
  0x1e   : > { %2373 = sst [smem:[#allocation21_spill]] %s2101_s21  ;;  %s1633_s23 = sshll.u32 (!%p428_p10), %s2104_s22, 3 }
  0x1f   : > { %s1634_s24 = sshll.u32 (!%p428_p10), %s2104_s22, 4  ;;  %p593_p13 = scmp.eq.s32.totalorder (!%p428_p10), %s1957_s30, 0 }
  0x20   : > { %s2136_s19 = scalar_lea.vmem (!%p428_p10), [#allocation5], %s1633_s23  ;;  %s2138_s15 = scalar_lea.vmem (!%p428_p10), [#allocation7], %s1634_s24 }
  0x22   : > { %s525_s25 = scalar_select %p524_p12, %s1961_s9, 1 }
  0x23   : > { %600 = sbr.rel (!%p593_p13) target bundleno = 42 (0x2a), region = 52  ;;  %vm602_vm0 = vcmask (%p593_p13), 261120  }
  0x24   : > { %s2111_s26 = sshll.u32 %s525_s25, 3  ;;  %s1639_s13 = sshll.u32 %s525_s25, 1 }
  0x25   : > { %s533_s20 = scalar_lea.vmem %s2337_s0, %s2111_s26  ;;  %s543_s11 = scalar_lea.vmem %s2338_s1, %s2111_s26 }
  0x26   : > { %s554_s29 = scalar_lea.vmem %s2339_s2, %s2111_s26  ;;  %s570_s27 = scalar_lea.vmem %s2341_s4, %s2111_s26 }
  0x27   : > { %s580_s25 = scalar_lea.vmem %s2342_s5, %s1639_s13  ;;  %s587_s14 = scalar_lea.vmem %s2343_s6, %s2111_s26 }
  0x28   : > { %v601_v0 = vld [vmem:[%s587_s14] sm:$0xff] (%p593_p13) }
  0x29   : > { %603 = vst.msk [vmem:[%s2136_s19] sm:$0xff] (%p593_p13), %vm602_vm0, %v601_v0 }
  0x2a PF: > { %v2141_v1 = vld [vmem:[%s570_s27] sm:$0xff]  ;;  %p1643_p0 = scmp.ne.s32.totalorder %s1957_s30, 0 }
  0x2b   : > { %v2143_v2 = vld [vmem:[%s580_s25] sm:$0x3]  ;;  %vm620_vm2 = vcmask (!%p1643_p0), 130048   ;;  %s1975_s7 = smov (!%p1643_p0), 112   ;;  %v1976_v5 = vmov (!%p1643_p0), 0.0   ;;  %vm1977_vm3 = vmmov (!%p1643_p0), 0  }
  0x2c   : > { %v2145_v3 = vld [vmem:[%s533_s20] sm:$0xff]  ;;  %vm606_vm1 = vnez %v2143_v2  ;;  %611 = sbr.rel (%p1643_p0) target bundleno = 814 (0x32e), region = 56  ;;  %1686 = vmatprep.subr.mxu0 (!%p1643_p0), %v1976_v5  ;;  %621 = vst.msk [vmem:[#allocation4] sm:$0xff] (!%p1643_p0), %vm620_vm2, %v1976_v5  ;;  %622 = vst.msk [vmem:[#allocation4 + $0x8] sm:$0xff] (!%p1643_p0), %vm620_vm2, %v1976_v5  ;;  %1688 = vmatprep.mubr.msk.f32.mxu0 (!%p1643_p0), %vm1977_vm3, %v1976_v5  ;;  %v1978_v6 = vmov (!%p1643_p0), 0   ;;  %vm706_vm5 = vcmask (!%p1643_p0), 64512  }
  0x2d   : > { %v2148_v4 = vld [vmem:[%s543_s11] sm:$0xff]  ;;  %1691 = vmatprep.subr.mxu1 (!%p1643_p0), %v1976_v5  ;;  %1693 = vmatprep.mubr.msk.f32.mxu1 (!%p1643_p0), %vm1977_vm3, %v1976_v5  ;;  %v701_v9 = vsel (!%p1643_p0), %vm606_vm1, 16843009, %v1978_v6  ;;  %vm615_vm6 = vcmask (!%p1643_p0), 7168   ;;  %v1979_v17 = vmov (!%p1643_p0), -inf  }
  0x2e   : > { %733 = vrot.lane.b32.xlu0 (!%p1643_p0), %v2148_v4, %s1975_s7  ;;  %1687 = vmatpush3.xpose.msk.msra.mxu0 (!%p1643_p0), %vm620_vm2, %v2148_v4  ;;  %v702_v10 = vunpack.c.0.s8 (!%p1643_p0), %v701_v9  ;;  %616 = vst.msk [vmem:[#allocation2] sm:$0xff] (!%p1643_p0), %vm615_vm6, %v1979_v17  ;;  %617 = vst.msk [vmem:[#allocation2 + $0x8] sm:$0xff] (!%p1643_p0), %vm615_vm6, %v1979_v17 }
  0x2f   : > { %1827 = vset.pattern.permute.xlu0 (!%p1643_p0), %v1978_v6  ;;  %1828 = vset.pattern.permute.xlu1 (!%p1643_p0), %v1978_v6  ;;  %618 = vst.msk [vmem:[#allocation3] sm:$0xff] (!%p1643_p0), %vm615_vm6, %v1976_v5  ;;  %619 = vst.msk [vmem:[#allocation3 + $0x8] sm:$0xff] (!%p1643_p0), %vm615_vm6, %v1976_v5 }
  0x30   : > { %vm2163_vm4 = vcmp.ne.s32.totalorder (!%p1643_p0), %v702_v10, 0 }
  0x31   : > { %1689 = vmatmul.mubr.msk.f32.vlgmr.msra.gmra.mrb[0].mxu0 (!%p1643_p0), %vm620_vm2, %v2145_v3 }
  0x32   : > { %731 = vrot.lane.b32.xlu0 (!%p1643_p0), %v2145_v3, %s1975_s7 }
  0x35   : > { %v705_v23 = vld [vmem:[#allocation2] sm:$0xff]  ;;  %v812_v27 = vld [vmem:[#allocation2 + $0x8] sm:$0xff] }
  0x36   : > { %v711_v43 = vld [vmem:[#allocation3] sm:$0xff]  ;;  %v818_v49 = vld [vmem:[#allocation3 + $0x8] sm:$0xff] }
  0xa0   : > { %v734_v7 = vpop.permute.xlu0 %733 }
  0xa1   : > { %1692 = vmatpush3.xpose.msk.msra.mxu1 %vm620_vm2, %v734_v7 }
  0xa4   : > { %v732_v8 = vpop.permute.xlu0 %731 }
  0xa5   : > { %1694 = vmatmul.mubr.msk.f32.vlgmr.msra.gmra.mrb[0].mxu1 %vm620_vm2, %v732_v8 }
 0x104   : > { %v696_v11 = vpop.f32.mrb[0].mxu0 }
 0x105   : > { %v700_v13 = vmul.f32 %v696_v11, %v2141_v1  ;;  %v1690_v14 = vpop.f32.mrb[1].mxu0 }
 0x107   : > { %v704_v15 = vsel %vm2163_vm4, -1e+10, %v700_v13 }
 0x108   : > { %v707_v16 = vsel %vm706_vm5, %v704_v15, -inf }
 0x109   : > { %708 = vmax.xlane.f32.xlu1 %v707_v16 }
 0x178   : > { %v805_v18 = vpop.f32.mrb[0].mxu1 }
 0x179   : > { %v809_v19 = vmul.f32 %v805_v18, %v2141_v1  ;;  %v1695_v20 = vpop.f32.mrb[1].mxu1 }
 0x17b   : > { %v810_v21 = vsel %vm2163_vm4, -1e+10, %v809_v19 }
 0x17c   : > { %v813_v22 = vsel %vm706_vm5, %v810_v21, -inf }
 0x17d   : > { %814 = vmax.xlane.f32.xlu1 %v813_v22 }
 0x196   : > { %v709_v24 = vpop.xlane.xlu1 %708 }
 0x197   : > { %v710_v25 = vmax.f32 %v705_v23, %v709_v24 }
 0x199   : > { %v712_v26 = vsub.f32 %v705_v23, %v710_v25  ;;  %730 = vst.msk [vmem:[#allocation2] sm:$0xff] %vm615_vm6, %v710_v25  ;;  %718 = vperm.xlu0 %1827, %v710_v25  }
 0x19b   : > { %v713_v41 = vmul.f32 1.442695, %v712_v26 }
 0x20a   : > { %v815_v28 = vpop.xlane.xlu1 %814 }
 0x20b   : > { %v816_v29 = vmax.f32 %v812_v27, %v815_v28 }
 0x20d   : > { %v819_v30 = vsub.f32 %v812_v27, %v816_v29  ;;  %836 = vst.msk [vmem:[#allocation2 + $0x8] sm:$0xff] %vm615_vm6, %v816_v29  ;;  %825 = vperm.xlu1 %1828, %v816_v29  }
 0x20f   : > { %v820_v47 = vmul.f32 1.442695, %v819_v30 }
 0x218   : > { %v719_v31 = vpop.permute.xlu0 %718 }
 0x219   : > { %v721_v32 = vsub.f32 %v704_v15, %v719_v31 }
 0x21b   : > { %v722_v33 = vmul.f32 1.442695, %v721_v32 }
 0x21d   : > { %1829 = vpow2.f32 %v722_v33 }
 0x227   : > { %v1830_v34 = vpop.eup %1829 }
 0x228   : > { %v724_v35 = vsel %vm706_vm5, %v1830_v34, 0.0 }
 0x229   : > { %725 = vadd.xlane.f32.xlu0 %v724_v35 }
 0x28c   : > { %v826_v36 = vpop.permute.xlu1 %825 }
 0x28d   : > { %v828_v37 = vsub.f32 %v810_v21, %v826_v36 }
 0x28f   : > { %v829_v38 = vmul.f32 1.442695, %v828_v37 }
 0x291   : > { %1831 = vpow2.f32 %v829_v38 }
 0x292   : > { %1833 = vpow2.f32 %v713_v41 }
 0x293   : > { %1835 = vpow2.f32 %v820_v47 }
 0x29b   : > { %v1832_v39 = vpop.eup %1831 }
 0x29c   : > { %v831_v40 = vsel %vm706_vm5, %v1832_v39, 0.0  ;;  %v1834_v42 = vpop.eup %1833 }
 0x29d   : > { %832 = vadd.xlane.f32.xlu1 %v831_v40  ;;  %v715_v44 = vmul.f32 %v1834_v42, %v711_v43  ;;  %v1836_v48 = vpop.eup %1835 }
 0x29e   : > { %v822_v50 = vmul.f32 %v1836_v48, %v818_v49 }
 0x2b6   : > { %v726_v45 = vpop.xlane.xlu0 %725 }
 0x2b7   : > { %v727_v46 = vadd.f32 %v726_v45, %v715_v44 }
 0x2b9   : > { %729 = vst.msk [vmem:[#allocation3] sm:$0xff] %vm615_vm6, %v727_v46 }
 0x32a   : > { %v833_v51 = vpop.xlane.xlu1 %832 }
 0x32b   : > { %v834_v52 = vadd.f32 %v833_v51, %v822_v50 }
 0x32d   : > { %835 = vst.msk [vmem:[#allocation3 + $0x8] sm:$0xff] %vm615_vm6, %v834_v52 }
 0x32e PF: > { %p1648_p1 = scmp.ne.s32.totalorder %s1957_s30, 1 }
 0x32f   : > { %vm842_vm7 = vcmask (!%p1648_p1), 130048   ;;  %s1980_s8 = smov (!%p1648_p1), 112   ;;  %v1981_v53 = vmov (!%p1648_p1), 0.0   ;;  %vm1982_vm8 = vmmov (!%p1648_p1), 0   ;;  %v1983_v55 = vmov (!%p1648_p1), 0   ;;  %v841_v57 = vld [vmem:[%s554_s29] sm:$0xff] (!%p1648_p1) }
 0x330   : > { %840 = sbr.rel (%p1648_p1) target bundleno = 1604 (0x644), region = 64  ;;  %1021 = vrot.lane.b32.xlu0 (!%p1648_p1), %v2148_v4, %s1980_s8  ;;  %1696 = vmatprep.subr.mxu0 (!%p1648_p1), %v1981_v53  ;;  %v924_v54 = vld [vmem:[#allocation2] sm:$0xff] (!%p1648_p1)  ;;  %v1100_v56 = vld [vmem:[#allocation2 + $0x8] sm:$0xff] (!%p1648_p1)  ;;  %v920_v62 = vsel (!%p1648_p1), %vm606_vm1, 16843009, %v1983_v55  ;;  %vm941_vm10 = vcmask (!%p1648_p1), 64512  }
 0x331   : > { %1697 = vmatpush3.xpose.msk.msra.mxu0 (!%p1648_p1), %vm842_vm7, %v2148_v4  ;;  %1698 = vmatprep.mubr.msk.f32.mxu0 (!%p1648_p1), %vm1982_vm8, %v1981_v53  ;;  %v933_v58 = vld [vmem:[#allocation3] sm:$0xff] (!%p1648_p1)  ;;  %v921_v63 = vunpack.c.0.s8 (!%p1648_p1), %v920_v62  ;;  %v1204_v15 = vld [vmem:[%s2340_s3] sm:$0xff] (!%p1648_p1)  ;;  %v1205_v16 = vld [vmem:[%s2340_s3 + $0x8] sm:$0xff] (!%p1648_p1)  ;;  %v1984_v17 = vmov (!%p1648_p1), 0.0|0.0   ;;  %vm1359_vm11 = vcmask (!%p1648_p1), 261120  }
 0x332   : > { %1706 = vmatprep.subr.mxu1 (!%p1648_p1), %v1981_v53  ;;  %1708 = vmatprep.mubr.msk.f32.mxu1 (!%p1648_p1), %vm1982_vm8, %v1981_v53  ;;  %v1731_v18 = vpack.c.bf16 (!%p1648_p1), %v1205_v16, %v1204_v15  ;;  %v943_v29 = vld [vmem:[#allocation4] sm:$0xff] (!%p1648_p1)  ;;  %v1206_v32 = vld [vmem:[%s2340_s3 + $0x10] sm:$0xff] (!%p1648_p1)  ;;  %v1207_v33 = vld [vmem:[%s2340_s3 + $0x18] sm:$0xff] (!%p1648_p1) }
 0x333   : > { %1837 = vset.pattern.permute.xlu1 (!%p1648_p1), %v1983_v55  ;;  %1838 = vset.pattern.permute.xlu0 (!%p1648_p1), %v1983_v55  ;;  %vm2213_vm9 = vcmp.ne.s32.totalorder (!%p1648_p1), %v921_v63, 0  ;;  %v1734_v34 = vpack.c.bf16 (!%p1648_p1), %v1207_v33, %v1206_v32  ;;  %v1121_v36 = vld [vmem:[#allocation4 + $0x8] sm:$0xff] (!%p1648_p1)  ;;  %v1208_v41 = vld [vmem:[%s2136_s19] sm:$0xff] (!%p1648_p1) }
 0x334   : > { %1019 = vrot.lane.b32.xlu0 (!%p1648_p1), %v2145_v3, %s1980_s8  ;;  %1699 = vmatmul.mubr.msk.f32.vlgmr.msra.gmra.mrb[0].mxu0 (!%p1648_p1), %vm842_vm7, %v2145_v3  ;;  %v1110_v59 = vld [vmem:[#allocation3 + $0x8] sm:$0xff] (!%p1648_p1) }
 0x335   : > { %927 = vperm.xlu1 (!%p1648_p1), %1837, %v924_v54   ;;  %1701 = vmatprep.subr.mxu0 (!%p1648_p1), %v1981_v53 }
 0x336   : > { %1702 = vmatpush3.msra.mxu0 (!%p1648_p1), %v841_v57  ;;  %1703 = vmatprep.mubr.msk.f32.mxu0 (!%p1648_p1), %vm1982_vm8, %v1981_v53 }
 0x337   : > { %1711 = vmatprep.subr.mxu0 %v1981_v53 }
 0x338   : > { %1103 = vperm.xlu0 %1838, %v1100_v56  }
 0x339   : > { %936 = vperm.xlu1 %1837, %v933_v58  }
 0x33d   : > { %1113 = vperm.xlu1 %1837, %v1110_v59  }
 0x341   : > { %1123 = vrot.lane.b32.xlu1 %v841_v57, %s1980_s8 }
 0x3a2   : > { %v1022_v60 = vpop.permute.xlu0 %1021 }
 0x3a3   : > { %1707 = vmatpush3.xpose.msk.msra.mxu1 %vm842_vm7, %v1022_v60 }
 0x3a4   : > { %1730 = vmatprep.subr.bf16.mxu1 %v1984_v17 }
 0x3a6   : > { %v1020_v61 = vpop.permute.xlu0 %1019 }
 0x3a7   : > { %1709 = vmatmul.mubr.msk.f32.vlgmr.msra.gmra.mrb[0].mxu1 %vm842_vm7, %v1020_v61 }
 0x3a8   : > { %1720 = vmatprep.mubr.msk.f32.mxu1 %vm1982_vm8, %v1981_v53  ;;  %1732 = vmatpush3.bf16.msra.mxu1 %v1731_v18 }
 0x3a9   : > { %1733 = vmatprep.subr.bf16.mxu1 %v1984_v17 }
 0x3b4   : > { %v928_v0 = vpop.permute.xlu1 %927 }
 0x3b7   : > { %v1104_v22 = vpop.permute.xlu0 %1103 }
 0x3b8   : > { %v937_v9 = vpop.permute.xlu1 %936 }
 0x3b9   : > { %1839 = vrcp.f32 %v937_v9 }
 0x3bc   : > { %v1114_v2 = vpop.permute.xlu1 %1113 }
 0x3c0   : > { %v1124_v14 = vpop.permute.xlu1 %1123 }
 0x3c3   : > { %v1840_v11 = vpop.eup %1839 }
 0x407   : > { %v915_v3 = vpop.f32.mrb[0].mxu0 }
 0x408   : > { %v919_v5 = vmul.f32 %v915_v3, %v2141_v1  ;;  %v1700_v6 = vpop.f32.mrb[1].mxu0 }
 0x40a   : > { %v923_v7 = vsel %vm2213_vm9, -1e+10, %v919_v5 }
 0x40b   : > { %v930_v8 = vsub.f32 %v923_v7, %v928_v0 }
 0x40d   : > { %v931_v10 = vmul.f32 1.442695, %v930_v8 }
 0x40f   : > { %1841 = vpow2.f32 %v931_v10 }
 0x410   : > { %1843 = vrcp.f32 %v1114_v2 }
 0x419   : > { %v1842_v12 = vpop.eup %1841 }
 0x41a   : > { %v940_v13 = vmul.f32 %v1842_v12, %v1840_v11  ;;  %v1844_v26 = vpop.eup %1843 }
 0x41c   : > { %942 = vst.msk [vmem:[%s2138_s15] sm:$0xff] %vm941_vm10, %v940_v13  ;;  %1704 = vmatmul.mubr.msk.f32.vlgmr.msra.gmra.mrb[2].mxu0 %vm941_vm10, %v940_v13 }
 0x41d   : > { %1712 = vmatpush3.msra.mxu0 %v1124_v14  ;;  %1713 = vmatprep.mubr.msk.f32.mxu0 %vm1982_vm8, %v1981_v53 }
 0x47a   : > { %v1093_v19 = vpop.f32.mrb[0].mxu1 }
 0x47b   : > { %v1097_v20 = vmul.f32 %v1093_v19, %v2141_v1  ;;  %v1710_v21 = vpop.f32.mrb[1].mxu1 }
 0x47d   : > { %v1098_v23 = vsel %vm2213_vm9, -1e+10, %v1097_v20 }
 0x47e   : > { %v1106_v24 = vsub.f32 %v1098_v23, %v1104_v22 }
 0x480   : > { %v1107_v25 = vmul.f32 1.442695, %v1106_v24 }
 0x482   : > { %1845 = vpow2.f32 %v1107_v25 }
 0x48c   : > { %v1846_v27 = vpop.eup %1845 }
 0x48d   : > { %v1117_v28 = vmul.f32 %v1846_v27, %v1844_v26 }
 0x48f   : > { %1654 = vst.msk [vmem:[%s2138_s15 + $0x8] sm:$0xff] %vm941_vm10, %v1117_v28  ;;  %1714 = vmatmul.mubr.msk.f32.vlgmr.msra.gmra.mrb[4].mxu0 %vm941_vm10, %v1117_v28 }
 0x4ef   : > { %v1013_v30 = vpop.f32.mrb[2].mxu0 }
 0x4f0   : > { %v1017_v31 = vadd.f32 %v1013_v30, %v943_v29  ;;  %v1705_v1 = vpop.f32.mrb[3].mxu0 }
 0x4f2   : > { %1018 = vst.msk [vmem:[#allocation4] sm:$0xff] %vm842_vm7, %v1017_v31 }
 0x4f9   : > { %v1209_v35 = vld [vmem:[#allocation4] sm:$0xff] }
 0x4fa   : > { %1721 = vmatmul.mubr.msk.f32.vlgmr.msra.gmra.mrb[2].mxu1 %vm842_vm7, %v1209_v35 }
 0x4fb   : > { %1735 = vmatpush3.bf16.msra.mxu1 %v1734_v34  ;;  %1727 = vmatprep.mubr.msk.f32.mxu1 %vm1982_vm8, %v1981_v53 }
 0x562   : > { %v1195_v37 = vpop.f32.mrb[4].mxu0 }
 0x563   : > { %v1199_v38 = vadd.f32 %v1195_v37, %v1121_v36  ;;  %v1715_v39 = vpop.f32.mrb[5].mxu0 }
 0x565   : > { %1200 = vst.msk [vmem:[#allocation4 + $0x8] sm:$0xff] %vm842_vm7, %v1199_v38 }
 0x56c   : > { %v1284_v40 = vld [vmem:[#allocation4 + $0x8] sm:$0xff] }
 0x56d   : > { %1728 = vmatmul.mubr.msk.f32.vlgmr.msra.gmra.mrb[2].mxu1 %vm842_vm7, %v1284_v40 }
 0x640   : > { %v1354_v42 = vpop.f32.mrb[2].mxu1 }
 0x641   : > { %v1736_v43 = vadd.f32 %v1354_v42, %v1208_v41  ;;  %v1729_v44 = vpop.f32.mrb[3].mxu1 }
 0x643   : > { %1360 = vst.msk [vmem:[%s2136_s19] sm:$0xff] %vm1359_vm11, %v1736_v43 }
 0x644 PF: > { %s1660_s23 = sshll.u32 %s1961_s9, 7  ;;  %s2379_s13 = sld [smem:[#allocation22_spill]] }
 0x645   : > { %s1381_s25 = sshll.u32 %s2136_s19, 4  ;;  %s1362_s14 = scalar_lea.sflag [#allocation6], %s2104_s22  ;;  %s1382_s25 = int_to_ptr.vmem [resolvable:$true] %s1381_s25 }
 0x646   : > { %s1847_s7 = scalar_lea.vmem %s1382_s25, 128  ;;  %s1985_s8 = smov [#allocation5]  }
 0x647   : > { %p1848_p2 = scmp.ne.s32.totalorder %s1382_s25, %s1847_s7  ;;  %s1851_s27 = sshll.u32 %s1985_s8, 4  ;;  %s1852_s27 = int_to_ptr.vmem [resolvable:$false] %s1851_s27 }
 0x648   : > { %s1853_s28 = scalar_lea.vmem %s1852_s27, 256  ;;  %p1854_p6 = scmp.lt.s32.totalorder %s1382_s25, %s1852_s27 }
 0x649   : > { %p1849_p4 = pnand %p1848_p2, %p2083_p3  ;;  %p1855_p7 = scmp.lt.s32.totalorder %s1853_s28, %s1847_s7 }
 0x64a   : > { %s2255_s20 = scalar_lea.hbm %s2379_s13, %s1660_s23 }
 0x64b   : > { %p1850_p5 = pneg %p1849_p4  ;;  %p1856_p8 = por %p1855_p7, %p1854_p6 }
 0x64d   : > { %p1857_p10 = pnand %p1856_p8, %p1850_p5 }
 0x64f   : > { %1860 = shalt.err (!%p1857_p10)
}
 0x650   : > { %s1861_s19 = scalar_lea.hbm %s2255_s20, 128  ;;  %s1865_s10 = scalar_lea.hbm %s2379_s13, 256 }
 0x651   : > { %p1862_p11 = scmp.ne.s32.totalorder %s2255_s20, %s1861_s19  ;;  %p1866_p0 = scmp.lt.u32.totalorder %s2255_s20, %s2379_s13 }
 0x652   : > { %p1867_p1 = scmp.lt.u32.totalorder %s1865_s10, %s1861_s19  ;;  %p1869_p4 = scmp.lt.u32.totalorder %s1861_s19, %s2255_s20 }
 0x653   : > { %p1863_p12 = pnand %p1862_p11, %p2083_p3 }
 0x654   : > { %p1868_p2 = por %p1867_p1, %p1866_p0 }
 0x655   : > { %p1864_p13 = pneg %p1863_p12 }
 0x656   : > { %p1870_p5 = por %p1869_p4, %p1868_p2 }
 0x658   : > { %p1871_p6 = pnand %p1870_p5, %p1864_p13 }
 0x65a   : > { %1874 = shalt.err (!%p1871_p6)
}
 0x65b   : > { %1739 = dma.vmem_to_hbm [thread:$0]  (%p2083_p3), %s1382_s25, 128, %s2255_s20, %s1362_s14  }
 0x65c   : > { %s1667_s16 = sshll.u32 %s1961_s9, 8  ;;  %s1399_s17 = sshll.u32 %s2138_s15, 4  ;;  %s2283_s17 = int_to_ptr.vmem [resolvable:$true] %s1399_s17 }
 0x65d   : > { %s2380_s24 = sld [smem:[#allocation23_spill]]  ;;  %s1367_s7 = scalar_lea.sflag [#allocation8], %s2104_s22 }
 0x65e   : > { %s1875_s8 = scalar_lea.vmem %s2283_s17, 256  ;;  %s1986_s27 = smov [#allocation7]  }
 0x65f   : > { %p1876_p7 = scmp.ne.s32.totalorder %s2283_s17, %s1875_s8  ;;  %s1879_s20 = sshll.u32 %s1986_s27, 4  ;;  %s1880_s20 = int_to_ptr.vmem [resolvable:$false] %s1879_s20 }
 0x660   : > { %s1881_s9 = scalar_lea.vmem %s1880_s20, 512  ;;  %p1882_p11 = scmp.lt.s32.totalorder %s2283_s17, %s1880_s20 }
 0x661   : > { %p1877_p8 = pnand %p1876_p7, %p2083_p3  ;;  %p1883_p12 = scmp.lt.s32.totalorder %s1881_s9, %s1875_s8 }
 0x663   : > { %s2281_s26 = scalar_lea.hbm %s2380_s24, %s1667_s16  ;;  %p1878_p10 = pneg %p1877_p8 }
 0x664   : > { %p1884_p13 = por %p1883_p12, %p1882_p11 }
 0x666   : > { %p1885_p0 = pnand %p1884_p13, %p1878_p10 }
 0x668   : > { %1888 = shalt.err (!%p1885_p0)
}
 0x669   : > { %s1889_s15 = scalar_lea.hbm %s2281_s26, 256  ;;  %s1893_s28 = scalar_lea.hbm %s2380_s24, 512 }
 0x66a   : > { %p1890_p1 = scmp.ne.s32.totalorder %s2281_s26, %s1889_s15  ;;  %p1894_p5 = scmp.lt.u32.totalorder %s2281_s26, %s2380_s24 }
 0x66b   : > { %p1895_p6 = scmp.lt.u32.totalorder %s1893_s28, %s1889_s15  ;;  %p1897_p8 = scmp.lt.u32.totalorder %s1889_s15, %s2281_s26 }
 0x66c   : > { %p1891_p2 = pnand %p1890_p1, %p2083_p3 }
 0x66d   : > { %p1896_p7 = por %p1895_p6, %p1894_p5 }
 0x66e   : > { %p1892_p4 = pneg %p1891_p2 }
 0x66f   : > { %p1898_p10 = por %p1897_p8, %p1896_p7 }
 0x671   : > { %p1899_p11 = pnand %p1898_p10, %p1892_p4 }
 0x673   : > { %1902 = shalt.err (!%p1899_p11)
}
 0x674   : > { %s1987_s30 = smov 128   ;;  %s1988_s10 = smov 8  }
 0x675   : > { %1740 = dma.vmem_to_hbm [thread:$0]  (%p2083_p3), %s2283_s17, 256, %s2281_s26, %s1367_s7, %s1987_s30, %s1987_s30, %s1988_s10  }
 0x676 PF: > { %s2381_s11 = sld [smem:[#allocation16_spill]]  ;;  %s2382_s12 = sld [smem:[#allocation11_spill]] }
 0x67c   : > { %p1750_p12 = scmp.ge.s32.totalorder %s2381_s11, 2  ;;  %s1414_s18 = sand.u32 1, %s2382_s12  }
 0x67d   : > { %s1415_s23 = scalar_lea.sflag [#allocation6], %s1414_s18 }
 0x67e   : > { %p1744_p13 = pnand %p1750_p12, %p2093_p9 }
 0x680   : > { %1936 = dma.done.wait (!%p1744_p13), %s1415_s23, 128  }
 0x681   : > { %1938 = vsyncadd (!%p1744_p13), %s1415_s23, 4294967168  ;;  %s1424_s8 = scalar_lea.sflag [#allocation8], %s1414_s18 }
 0x682   : > { %1940 = dma.done.wait (!%p1744_p13), %s1424_s8, 256  }
 0x683   : > { %1942 = vsyncadd (!%p1744_p13), %s1424_s8, 4294967040  ;;  %s25_s12 = sadd.s32 1, %s2381_s11   ;;  %s2384_s27 = sld [smem:[#allocation12_spill]] }
 0x684   : > { %p22_p0 = scmp.ge.s32.totalorder %s25_s12, 6   ;;  %s2385_s28 = sld [smem:[#allocation13_spill]] }
 0x685   : > { %s2386_s29 = sld [smem:[#allocation21_spill]]  ;;  %s2387_s30 = sld [smem:[#allocation14_spill]] }
 0x686   : > { %s2388_s9 = sld [smem:[#allocation15_spill]]  ;;  %s2389_s10 = sld [smem:[#allocation17_spill]] }
 0x687   : > { %s2390_s11 = sld [smem:[#allocation19_spill]]  ;;  %24 = sbr.rel (!%p22_p0) target bundleno = 10 (0xa), region = 144 }
 0x68e   :  { %1429 = vsyncpa [#allocation6], 1 }
 0x68f   :  { %1431 = vsyncpa [#allocation6 + $0x1], 1 }
 0x690   :  { %1432 = vsyncpa [#allocation8], 1 }
 0x691   :  { %1434 = vsyncpa [#allocation8 + $0x1], 1 }

</bundles_post_ra>
